<compile_context>
chip_gen: v6e
topology: v6e:2x2x1
jax: 0.10.0
libtpu: 0.0.40
codegen_flags: <defaults>
</compile_context>

<pallas_src>
import functools

import jax
import jax.numpy as jnp
from jax.experimental import pallas as pl
from jax.experimental.pallas import tpu as pltpu


def _round_up(x, m):
    return (x + m - 1) // m * m


# ----------------------------------------------------------------------------
# Fused (matmul + bias [+ relu]) kernel -- full-K blocks
# ----------------------------------------------------------------------------
def _mm_bias_kernel(a_ref, b_ref, c_ref, o_ref, *, relu):
    y = jnp.dot(a_ref[...], b_ref[...], preferred_element_type=jnp.float32)
    y = y + c_ref[...]
    if relu:
        y = jnp.maximum(y, 0.0)
    o_ref[...] = y.astype(o_ref.dtype)


def fused_matmul(a, b, bias, relu=False, tm=128, tn=128):
    """maybe_relu(a @ b + bias); BN scale already folded into b."""
    M, K = a.shape
    K2, N = b.shape
    assert K == K2
    tm_eff = tm if M >= tm else _round_up(M, 8)
    Mp = _round_up(M, tm_eff)
    if N >= tn:
        tn_eff, Np = tn, _round_up(N, tn)
    else:
        tn_eff, Np = N, N                    # full-dim lane block, no padding
    # v7x: keep >= 2 parallel grid steps when cheaply possible.
    if Mp // tm_eff == 1 and Np // tn_eff == 1 and Mp >= 64 and Mp % 16 == 0:
        tm_eff = Mp // 2
    a_p = a if Mp == M else jnp.pad(a, ((0, Mp - M), (0, 0)))
    b_p = b if Np == N else jnp.pad(b, ((0, 0), (0, Np - N)))
    bias_p = bias.reshape(1, N)
    if Np != N:
        bias_p = jnp.pad(bias_p, ((0, 0), (0, Np - N)))

    out = pl.pallas_call(
        functools.partial(_mm_bias_kernel, relu=relu),
        out_shape=jax.ShapeDtypeStruct((Mp, Np), jnp.float32),
        grid_spec=pltpu.PrefetchScalarGridSpec(
            num_scalar_prefetch=0,
            grid=(Mp // tm_eff, Np // tn_eff),
            in_specs=[
                pl.BlockSpec((tm_eff, K), lambda i, j: (i, 0)),
                pl.BlockSpec((K, tn_eff), lambda i, j: (0, j)),
                pl.BlockSpec((1, tn_eff), lambda i, j: (0, j)),
            ],
            out_specs=pl.BlockSpec((tm_eff, tn_eff), lambda i, j: (i, j)),
        ),
        compiler_params=pltpu.CompilerParams(
            dimension_semantics=("parallel", "parallel")),
    )(a_p, b_p, bias_p)
    if Mp != M or Np != N:
        out = out[:M, :N]
    return out


# ----------------------------------------------------------------------------
# Direct 3x3 / stride-1 / pad-1 convolution on the flat padded-wide layout.
#
# The activation is (N*(H+2)*(W+2), Cin) with zero borders (per-image pad-1
# layout, flattened).  Every tap (di, dj) is a row-shifted window of that slab,
# so the conv is 9 (or 3, with K-folding) in-VMEM matmuls accumulated on the
# MXU.  The output is produced in the same layout; border rows are re-zeroed
# in-kernel, so the residual add + ReLU fuse into the epilogue and consecutive
# stride-1 convs chain without XLA pad/slice glue.
# ----------------------------------------------------------------------------
def _conv3x3s1_accum(x_ref, w_ref, row0, *, wp, pad, cin, bm, tn, fold_taps):
    acc = jnp.zeros((bm, tn), jnp.float32)
    if fold_taps:
        # fold the 3 taps of a kernel row into one K = 3*cin matmul
        for di in range(3):
            base = row0 + pad + (di - 1) * wp - 1
            a = jnp.concatenate(
                [x_ref[pl.ds(base + dj, bm), :] for dj in range(3)], axis=1)
            wt = w_ref[di * 3 * cin:(di + 1) * 3 * cin, :]
            acc = acc + jnp.dot(a, wt, preferred_element_type=jnp.float32)
    else:
        for t in range(9):
            di, dj = t // 3, t % 3
            start = row0 + pad + (di - 1) * wp + (dj - 1)
            a = x_ref[pl.ds(start, bm), :]
            wt = w_ref[t * cin:(t + 1) * cin, :]
            acc = acc + jnp.dot(a, wt, preferred_element_type=jnp.float32)
    return acc


def _conv3x3s1_kernel(x_ref, w_ref, b_ref, m_ref, o_ref, *, wp, pad, cin, bm,
                      fold_taps, relu):
    row0 = pl.program_id(0) * bm
    if bm % 8 == 0:
        row0 = pl.multiple_of(row0, 8)
    acc = _conv3x3s1_accum(x_ref, w_ref, row0, wp=wp, pad=pad, cin=cin, bm=bm,
                           tn=o_ref.shape[1], fold_taps=fold_taps)
    y = acc + b_ref[...]
    if relu:
        y = jnp.maximum(y, 0.0)
    o_ref[...] = (y * m_ref[...]).astype(o_ref.dtype)


def _conv3x3s1_res_kernel(x_ref, w_ref, b_ref, m_ref, r_ref, o_ref, *, wp, pad,
                          cin, bm, fold_taps, relu):
    row0 = pl.program_id(0) * bm
    if bm % 8 == 0:
        row0 = pl.multiple_of(row0, 8)
    acc = _conv3x3s1_accum(x_ref, w_ref, row0, wp=wp, pad=pad, cin=cin, bm=bm,
                           tn=o_ref.shape[1], fold_taps=fold_taps)
    y = acc + b_ref[...] + r_ref[...]          # fused residual
    if relu:
        y = jnp.maximum(y, 0.0)
    o_ref[...] = (y * m_ref[...]).astype(o_ref.dtype)


def _pick_bm(S, target=256):
    """Largest multiple-of-8 divisor of S that is <= target (else S)."""
    if S <= target:
        return S
    best = S
    for d in range(8, target + 1, 8):
        if S % d == 0:
            best = d
    return best


def conv3x3s1_direct(x_flat, wmat, bias, *, N, H, W, relu, residual=None):
    """3x3 / stride-1 / pad-1 conv (+bias [+residual] [+relu]) in padded-wide
    layout.  x_flat: (N*(H+2)*(W+2), Cin), zero borders.  Returns the same
    layout with Cout channels and zero borders."""
    Hp, Wp = H + 2, W + 2
    S = N * Hp * Wp
    C = x_flat.shape[1]
    cout = wmat.shape[1]
    # slack rows (values irrelevant) so every tap window stays in-bounds
    PAD = _round_up(Wp + 1, 8)
    x_ext = jnp.pad(x_flat, ((PAD, PAD), (0, 0)))

    # 0/1 mask of rows that hold real pixels (constant-folded by XLA).
    rows = jnp.arange(S, dtype=jnp.int32)
    m = rows % (Hp * Wp)
    pi, pj = m // Wp, m % Wp
    mask = ((pi >= 1) & (pi <= H) & (pj >= 1) & (pj <= W))
    mask = mask.astype(jnp.float32).reshape(S, 1)

    bm = _pick_bm(S)
    tn = 128 if cout >= 128 else cout
    fold_taps = (C % 128 == 0)
    grid = (S // bm, cout // tn)

    in_specs = [
        pl.BlockSpec((S + 2 * PAD, C), lambda i, j: (0, 0)),   # full slab, once
        pl.BlockSpec((9 * C, tn), lambda i, j: (0, j)),
        pl.BlockSpec((1, tn), lambda i, j: (0, j)),
        pl.BlockSpec((bm, 1), lambda i, j: (i, 0)),
    ]
    args = [x_ext, wmat, bias, mask]
    kw = dict(wp=Wp, pad=PAD, cin=C, bm=bm, fold_taps=fold_taps, relu=relu)
    if residual is not None:
        in_specs.append(pl.BlockSpec((bm, tn), lambda i, j: (i, j)))
        args.append(residual)
        kernel = functools.partial(_conv3x3s1_res_kernel, **kw)
    else:
        kernel = functools.partial(_conv3x3s1_kernel, **kw)

    return pl.pallas_call(
        kernel,
        out_shape=jax.ShapeDtypeStruct((S, cout), jnp.float32),
        grid_spec=pltpu.PrefetchScalarGridSpec(
            num_scalar_prefetch=0,
            grid=grid,
            in_specs=in_specs,
            out_specs=pl.BlockSpec((bm, tn), lambda i, j: (i, j)),
        ),
        compiler_params=pltpu.CompilerParams(
            dimension_semantics=("parallel", "parallel")),
    )(*args)


# ----------------------------------------------------------------------------
# im2col path (conv1 7x7/s2 and the three 3x3/s2 convs)
# ----------------------------------------------------------------------------
def _im2col(x, kh, kw, stride, pad):
    N, H, W, C = x.shape
    if pad > 0:
        x = jnp.pad(x, ((0, 0), (pad, pad), (pad, pad), (0, 0)))
    Hp, Wp = H + 2 * pad, W + 2 * pad
    Ho = (Hp - kh) // stride + 1
    Wo = (Wp - kw) // stride + 1
    cols = [x[:, i:i + stride * Ho:stride, j:j + stride * Wo:stride, :]
            for i in range(kh) for j in range(kw)]
    patches = jnp.stack(cols, axis=3)        # (N, Ho, Wo, kh*kw, C)
    return patches.reshape(N * Ho * Wo, kh * kw * C), (N, Ho, Wo)


def conv_im2col(x, wmat, bias, kh, kw, stride, pad, relu, tm=128):
    """General conv via im2col + fused matmul epilogue (x: NHWC)."""
    cout = wmat.shape[1]
    a, (N, Ho, Wo) = _im2col(x, kh, kw, stride, pad)
    out = fused_matmul(a, wmat, bias, relu=relu, tm=tm)
    return out.reshape(N, Ho, Wo, cout)


# ----------------------------------------------------------------------------
# MaxPool (tiled) and fused avgpool + dual-head kernels
# ----------------------------------------------------------------------------
def _maxpool_kernel(p_ref, o_ref):
    o_ref[...] = jnp.max(p_ref[...], axis=0)


def maxpool_3x3_s2(x, bm=512):
    """MaxPool2d(kernel=3, stride=2, padding=1) on NHWC, tiled over rows."""
    N, H, W, C = x.shape
    k, stride, pad = 3, 2, 1
    xp = jnp.pad(x, ((0, 0), (pad, pad), (pad, pad), (0, 0)),
                 constant_values=-jnp.inf)
    Hp, Wp = H + 2 * pad, W + 2 * pad
    Ho = (Hp - k) // stride + 1
    Wo = (Wp - k) // stride + 1
    cols = [xp[:, i:i + stride * Ho:stride, j:j + stride * Wo:stride, :]
            for i in range(k) for j in range(k)]
    M = N * Ho * Wo
    patches = jnp.stack(cols, axis=0).reshape(k * k, M, C)
    bm_eff = bm if M >= bm else _round_up(M, 8)
    Mp = _round_up(M, bm_eff)
    if Mp != M:
        patches = jnp.pad(patches, ((0, 0), (0, Mp - M), (0, 0)),
                          constant_values=-jnp.inf)
    out = pl.pallas_call(
        _maxpool_kernel,
        out_shape=jax.ShapeDtypeStruct((Mp, C), jnp.float32),
        grid_spec=pltpu.PrefetchScalarGridSpec(
            num_scalar_prefetch=0,
            grid=(Mp // bm_eff,),
            in_specs=[pl.BlockSpec((k * k, bm_eff, C), lambda i: (0, i, 0))],
            out_specs=pl.BlockSpec((bm_eff, C), lambda i: (i, 0)),
        ),
        compiler_params=pltpu.CompilerParams(
            dimension_semantics=("parallel",)),
    )(patches)
    if Mp != M:
        out = out[:M]
    return out.reshape(N, Ho, Wo, C)


def _head_kernel(x_ref, w_ref, b_ref, o_ref, *, scale):
    feats = jnp.sum(x_ref[...], axis=1) * scale        # global avgpool
    o_ref[...] = (jnp.dot(feats, w_ref[...],
                          preferred_element_type=jnp.float32)
                  + b_ref[...]).astype(o_ref.dtype)


def fused_avgpool_heads(x_flat, head_w, head_b, *, N, H, W, num_classes):
    """AdaptiveAvgPool2d((1,1)) + BOTH Linear heads in one kernel.

    x_flat is in padded-wide layout with zero borders, so sum/(H*W) == mean."""
    Hp, Wp = H + 2, W + 2
    C = x_flat.shape[1]
    x3 = x_flat.reshape(N, Hp * Wp, C)
    out = pl.pallas_call(
        functools.partial(_head_kernel, scale=1.0 / float(H * W)),
        out_shape=jax.ShapeDtypeStruct((N, head_w.shape[1]), jnp.float32),
    )(x3, head_w, head_b)
    return out[:, :num_classes], out[:, num_classes:2 * num_classes]


# ----------------------------------------------------------------------------
# CustomResnet18 forward (activations chained in padded-wide layout)
# ----------------------------------------------------------------------------
def to_padded_flat(x):
    """NHWC -> flat padded-wide (N*(H+2)*(W+2), C) with zero borders."""
    N, H, W, C = x.shape
    xp = jnp.pad(x, ((0, 0), (1, 1), (1, 1), (0, 0)))
    return xp.reshape(N * (H + 2) * (W + 2), C)


def basic_block_s1(x_flat, p, N, H, W):
    out = conv3x3s1_direct(x_flat, p['w1'], p['b1'], N=N, H=H, W=W, relu=True)
    return conv3x3s1_direct(out, p['w2'], p['b2'], N=N, H=H, W=W, relu=True,
                            residual=x_flat)


def basic_block_s2(x_flat, p, N, H, W):
    Hp, Wp = H + 2, W + 2
    C = x_flat.shape[1]
    xp = x_flat.reshape(N, Hp, Wp, C)        # already pad-1 padded
    # conv1: 3x3 / stride-2 (padding already present in the layout)
    out = conv_im2col(xp, p['w1'], p['b1'], 3, 3, stride=2, pad=0, relu=True)
    Ho, Wo = H // 2, W // 2
    # 1x1 / stride-2 downsample shortcut
    sc = xp[:, 1:H + 1:2, 1:W + 1:2, :].reshape(N * Ho * Wo, C)
    sc = fused_matmul(sc, p['down_w'], p['down_b'], relu=False)
    sc_flat = to_padded_flat(sc.reshape(N, Ho, Wo, -1))
    # conv2: 3x3 / stride-1 direct kernel with fused residual + relu
    out_flat = to_padded_flat(out)
    return conv3x3s1_direct(out_flat, p['w2'], p['b2'], N=N, H=Ho, W=Wo,
                            relu=True, residual=sc_flat)


def custom_resnet18_forward(prep, x_nchw, num_classes=100):
    x = jnp.transpose(x_nchw.astype(jnp.float32), (0, 2, 3, 1))   # NCHW->NHWC
    x = conv_im2col(x, prep['conv1_w'], prep['conv1_b'], 7, 7, stride=2, pad=3,
                    relu=True, tm=256)
    x = maxpool_3x3_s2(x)
    N, H, W, _ = x.shape
    x_flat = to_padded_flat(x)
    for blk in prep['layer1']:
        x_flat = basic_block_s1(x_flat, blk, N, H, W)
    for li in range(2, 5):
        blocks = prep[f'layer{li}']
        x_flat = basic_block_s2(x_flat, blocks[0], N, H, W)
        H, W = H // 2, W // 2
        x_flat = basic_block_s1(x_flat, blocks[1], N, H, W)
    return fused_avgpool_heads(x_flat, prep['head_w'], prep['head_b'],
                               N=N, H=H, W=W, num_classes=num_classes)


# ----------------------------------------------------------------------------
# One-time parameter preparation (hoisted out of the jitted forward)
# ----------------------------------------------------------------------------
def _fold_bn(w, bn, eps=1e-5):
    cout, cin, kh, kw = w.shape
    scale = bn['gamma'] / jnp.sqrt(bn['var'] + eps)
    bias = bn['beta'] - bn['mean'] * scale
    wmat = jnp.transpose(w, (2, 3, 1, 0)).reshape(kh * kw * cin, cout)
    return wmat * scale[None, :], bias.reshape(1, cout)


def prepare_params(params, num_classes):
    """Fold BN into weights, pre-transpose everything, pre-concat the heads."""
    prep = {'conv1_w': None, 'conv1_b': None}
    prep['conv1_w'], prep['conv1_b'] = _fold_bn(params['conv1'], params['bn1'])
    for li in range(1, 5):
        blocks = []
        for bp in params[f'layer{li}']:
            q = {}
            q['w1'], q['b1'] = _fold_bn(bp['w1'], bp['bn1'])
            q['w2'], q['b2'] = _fold_bn(bp['w2'], bp['bn2'])
            if 'down_w' in bp:
                q['down_w'], q['down_b'] = _fold_bn(bp['down_w'], bp['down_bn'])
            blocks.append(q)
        prep[f'layer{li}'] = blocks
    w_cat = jnp.concatenate([params['cl']['w'], params['student']['w']],
                            axis=0).T                      # (512, 2*nc)
    b_cat = jnp.concatenate([params['cl']['b'], params['student']['b']], axis=0)
    ncp = _round_up(2 * num_classes, 128)                  # lane-dense output
    prep['head_w'] = jnp.pad(w_cat, ((0, 0), (0, ncp - 2 * num_classes)))
    prep['head_b'] = jnp.pad(b_cat, (0, ncp - 2 * num_classes)).reshape(1, ncp)
    return prep


# ----------------------------------------------------------------------------
# Deterministic parameter init (synthetic; no checkpoint load)
# ----------------------------------------------------------------------------
class _KeyGen:
    def __init__(self, key):
        self.key = key

    def __call__(self):
        self.key, sub = jax.random.split(self.key)
        return sub


def _init_conv(kg, cout, cin, k):
    return 0.05 * jax.random.normal(kg(), (cout, cin, k, k), jnp.float32)


def _init_bn(kg, c):
    return {
        'gamma': 1.0 + 0.1 * jax.random.normal(kg(), (c,), jnp.float32),
        'beta': 0.1 * jax.random.normal(kg(), (c,), jnp.float32),
        'mean': 0.1 * jax.random.normal(kg(), (c,), jnp.float32),
        'var': 0.5 + jax.random.uniform(kg(), (c,), jnp.float32),
    }


def _init_linear(kg, out_dim, in_dim):
    return {
        'w': 0.05 * jax.random.normal(kg(), (out_dim, in_dim), jnp.float32),
        'b': 0.01 * jax.random.normal(kg(), (out_dim,), jnp.float32),
    }


def _init_block(kg, cin, cout, downsample):
    p = {
        'w1': _init_conv(kg, cout, cin, 3), 'bn1': _init_bn(kg, cout),
        'w2': _init_conv(kg, cout, cout, 3), 'bn2': _init_bn(kg, cout),
    }
    if downsample:
        p['down_w'] = _init_conv(kg, cout, cin, 1)
        p['down_bn'] = _init_bn(kg, cout)
    return p


def init_custom_resnet18(key, num_classes=100):
    kg = _KeyGen(key)
    params = {'conv1': _init_conv(kg, 64, 3, 7), 'bn1': _init_bn(kg, 64)}
    cfg = [(64, 64, 1), (64, 128, 2), (128, 256, 2), (256, 512, 2)]
    for li, (cin, cout, stride) in enumerate(cfg, 1):
        params[f'layer{li}'] = [
            _init_block(kg, cin, cout, downsample=(stride != 1 or cin != cout)),
            _init_block(kg, cout, cout, downsample=False),
        ]
    params['cl'] = _init_linear(kg, num_classes, 512)
    params['student'] = _init_linear(kg, num_classes, 512)
    return params


# ----------------------------------------------------------------------------
# Direct-conv self check (both tap modes) against lax.conv
# ----------------------------------------------------------------------------
def _check_direct_conv():
    key = jax.random.PRNGKey(7)
    for cin in (64, 128):               # non-folded and K-folded tap paths
        k1, k2, k3, key = jax.random.split(key, 4)
        N, H, W, cout = 2, 8, 8, cin
        x = jax.random.normal(k1, (N, H, W, cin), jnp.float32)
        w = 0.05 * jax.random.normal(k2, (cout, cin, 3, 3), jnp.float32)
        b = 0.1 * jax.random.normal(k3, (1, cout), jnp.float32)
        wmat = jnp.transpose(w, (2, 3, 1, 0)).reshape(9 * cin, cout)
        out = conv3x3s1_direct(to_padded_flat(x), wmat, b,
                               N=N, H=H, W=W, relu=False)
        out = out.reshape(N, H + 2, W + 2, cout)[:, 1:H + 1, 1:W + 1, :]
        ref = jax.lax.conv_general_dilated(
            x, jnp.transpose(w, (2, 3, 1, 0)), window_strides=(1, 1),
            padding='SAME', dimension_numbers=('NHWC', 'HWIO', 'NHWC'))
        ref = ref + b.reshape(1, 1, 1, cout)
        assert bool(jnp.allclose(out, ref, rtol=2e-2, atol=2e-2)), \
            f"direct conv mismatch (cin={cin})"


# ----------------------------------------------------------------------------
if __name__ == "__main__":
    num_classes = 100
    key = jax.random.PRNGKey(0)
    pkey, xkey = jax.random.split(key)

    params = init_custom_resnet18(pkey, num_classes=num_classes)
    prep = prepare_params(params, num_classes)     # once, outside the jit
    x = jax.random.normal(xkey, (2, 3, 64, 64), jnp.float32)     # NCHW input

    _check_direct_conv()                           # kernel self-test

    fwd = jax.jit(custom_resnet18_forward)
    cl_out, student_out = fwd(prep, x)
    cl_out, student_out = jax.block_until_ready((cl_out, student_out))

    assert cl_out.shape == (2, num_classes)
    assert student_out.shape == (2, num_classes)
    assert bool(jnp.all(jnp.isfinite(cl_out)))
    assert bool(jnp.all(jnp.isfinite(student_out)))
    print("KERNEL_OK")
</pallas_src>

<mosaic_0001>
module attributes {stable_mosaic.version = 11 : i64} {
  func.func @_conv3x3s1_kernel(%arg0: i32, %arg1: i32, %arg2: memref<232x64xf32, #tpu.memory_space<vmem>>, %arg3: memref<576x64xf32, #tpu.memory_space<vmem>>, %arg4: memref<1x64xf32, #tpu.memory_space<vmem>>, %arg5: memref<200x1xf32, #tpu.memory_space<vmem>>, %arg6: memref<200x64xf32, #tpu.memory_space<vmem>>) attributes {dimension_semantics = [#tpu.dimension_semantics<parallel>, #tpu.dimension_semantics<parallel>], iteration_bounds = array<i64: 1, 1>, scalar_prefetch = 0 : i64, scratch_operands = 0 : i64, tpu.core_type = #tpu.core_type<tc>, window_params = [{pipeline_mode = #tpu.pipeline_mode<synchronous>, transform_indices = @transform_0, window_bounds = array<i64: 232, 64>}, {transform_indices = @transform_1, window_bounds = array<i64: 576, 64>}, {transform_indices = @transform_2, window_bounds = array<i64: 1, 64>}, {transform_indices = @transform_3, window_bounds = array<i64: 200, 1>}, {transform_indices = @transform_4, window_bounds = array<i64: 200, 64>}]} {
    %c200_i32 = arith.constant 200 : i32
    %0 = arith.muli %arg0, %c200_i32 : i32
    %1 = tpu.assume_multiple %0, 8 : i32
    %cst = arith.constant 0.000000e+00 : f32
    %2 = vector.broadcast %cst : f32 to vector<200x64xf32>
    %c16_i32 = arith.constant 16 : i32
    %3 = arith.addi %1, %c16_i32 : i32
    %c-10_i32 = arith.constant -10 : i32
    %4 = arith.addi %3, %c-10_i32 : i32
    %c-1_i32 = arith.constant -1 : i32
    %5 = arith.addi %4, %c-1_i32 : i32
    %6 = arith.index_cast %5 : i32 to index
    %c0 = arith.constant 0 : index
    %7 = vector.load %arg2[%6, %c0] : memref<232x64xf32, #tpu.memory_space<vmem>>, vector<200x64xf32>
    %c0_0 = arith.constant 0 : index
    %c0_1 = arith.constant 0 : index
    %8 = vector.load %arg3[%c0_0, %c0_1] : memref<576x64xf32, #tpu.memory_space<vmem>>, vector<64x64xf32>
    %cst_2 = arith.constant dense<0.000000e+00> : vector<200x64xf32>
    %9 = tpu.matmul %7, %8, %cst_2 {dimension_numbers = #tpu.dot_dimension_numbers<[1], [0], [0], [1], [0, 0, 1, 1], [], []>} : vector<200x64xf32>, vector<64x64xf32>, vector<200x64xf32> -> vector<200x64xf32>
    %10 = arith.addf %2, %9 : vector<200x64xf32>
    %c16_i32_3 = arith.constant 16 : i32
    %11 = arith.addi %1, %c16_i32_3 : i32
    %c-10_i32_4 = arith.constant -10 : i32
    %12 = arith.addi %11, %c-10_i32_4 : i32
    %c0_i32 = arith.constant 0 : i32
    %13 = arith.addi %12, %c0_i32 : i32
    %14 = arith.index_cast %13 : i32 to index
    %c0_5 = arith.constant 0 : index
    %15 = vector.load %arg2[%14, %c0_5] : memref<232x64xf32, #tpu.memory_space<vmem>>, vector<200x64xf32>
    %c64 = arith.constant 64 : index
    %c0_6 = arith.constant 0 : index
    %16 = vector.load %arg3[%c64, %c0_6] : memref<576x64xf32, #tpu.memory_space<vmem>>, vector<64x64xf32>
    %cst_7 = arith.constant dense<0.000000e+00> : vector<200x64xf32>
    %17 = tpu.matmul %15, %16, %cst_7 {dimension_numbers = #tpu.dot_dimension_numbers<[1], [0], [0], [1], [0, 0, 1, 1], [], []>} : vector<200x64xf32>, vector<64x64xf32>, vector<200x64xf32> -> vector<200x64xf32>
    %18 = arith.addf %10, %17 : vector<200x64xf32>
    %c16_i32_8 = arith.constant 16 : i32
    %19 = arith.addi %1, %c16_i32_8 : i32
    %c-10_i32_9 = arith.constant -10 : i32
    %20 = arith.addi %19, %c-10_i32_9 : i32
    %c1_i32 = arith.constant 1 : i32
    %21 = arith.addi %20, %c1_i32 : i32
    %22 = arith.index_cast %21 : i32 to index
    %c0_10 = arith.constant 0 : index
    %23 = vector.load %arg2[%22, %c0_10] : memref<232x64xf32, #tpu.memory_space<vmem>>, vector<200x64xf32>
    %c128 = arith.constant 128 : index
    %c0_11 = arith.constant 0 : index
    %24 = vector.load %arg3[%c128, %c0_11] : memref<576x64xf32, #tpu.memory_space<vmem>>, vector<64x64xf32>
    %cst_12 = arith.constant dense<0.000000e+00> : vector<200x64xf32>
    %25 = tpu.matmul %23, %24, %cst_12 {dimension_numbers = #tpu.dot_dimension_numbers<[1], [0], [0], [1], [0, 0, 1, 1], [], []>} : vector<200x64xf32>, vector<64x64xf32>, vector<200x64xf32> -> vector<200x64xf32>
    %26 = arith.addf %18, %25 : vector<200x64xf32>
    %c16_i32_13 = arith.constant 16 : i32
    %27 = arith.addi %1, %c16_i32_13 : i32
    %c0_i32_14 = arith.constant 0 : i32
    %28 = arith.addi %27, %c0_i32_14 : i32
    %c-1_i32_15 = arith.constant -1 : i32
    %29 = arith.addi %28, %c-1_i32_15 : i32
    %30 = arith.index_cast %29 : i32 to index
    %c0_16 = arith.constant 0 : index
    %31 = vector.load %arg2[%30, %c0_16] : memref<232x64xf32, #tpu.memory_space<vmem>>, vector<200x64xf32>
    %c192 = arith.constant 192 : index
    %c0_17 = arith.constant 0 : index
    %32 = vector.load %arg3[%c192, %c0_17] : memref<576x64xf32, #tpu.memory_space<vmem>>, vector<64x64xf32>
    %cst_18 = arith.constant dense<0.000000e+00> : vector<200x64xf32>
    %33 = tpu.matmul %31, %32, %cst_18 {dimension_numbers = #tpu.dot_dimension_numbers<[1], [0], [0], [1], [0, 0, 1, 1], [], []>} : vector<200x64xf32>, vector<64x64xf32>, vector<200x64xf32> -> vector<200x64xf32>
    %34 = arith.addf %26, %33 : vector<200x64xf32>
    %c16_i32_19 = arith.constant 16 : i32
    %35 = arith.addi %1, %c16_i32_19 : i32
    %c0_i32_20 = arith.constant 0 : i32
    %36 = arith.addi %35, %c0_i32_20 : i32
    %c0_i32_21 = arith.constant 0 : i32
    %37 = arith.addi %36, %c0_i32_21 : i32
    %38 = arith.index_cast %37 : i32 to index
    %c0_22 = arith.constant 0 : index
    %39 = vector.load %arg2[%38, %c0_22] : memref<232x64xf32, #tpu.memory_space<vmem>>, vector<200x64xf32>
    %c256 = arith.constant 256 : index
    %c0_23 = arith.constant 0 : index
    %40 = vector.load %arg3[%c256, %c0_23] : memref<576x64xf32, #tpu.memory_space<vmem>>, vector<64x64xf32>
    %cst_24 = arith.constant dense<0.000000e+00> : vector<200x64xf32>
    %41 = tpu.matmul %39, %40, %cst_24 {dimension_numbers = #tpu.dot_dimension_numbers<[1], [0], [0], [1], [0, 0, 1, 1], [], []>} : vector<200x64xf32>, vector<64x64xf32>, vector<200x64xf32> -> vector<200x64xf32>
    %42 = arith.addf %34, %41 : vector<200x64xf32>
    %c16_i32_25 = arith.constant 16 : i32
    %43 = arith.addi %1, %c16_i32_25 : i32
    %c0_i32_26 = arith.constant 0 : i32
    %44 = arith.addi %43, %c0_i32_26 : i32
    %c1_i32_27 = arith.constant 1 : i32
    %45 = arith.addi %44, %c1_i32_27 : i32
    %46 = arith.index_cast %45 : i32 to index
    %c0_28 = arith.constant 0 : index
    %47 = vector.load %arg2[%46, %c0_28] : memref<232x64xf32, #tpu.memory_space<vmem>>, vector<200x64xf32>
    %c320 = arith.constant 320 : index
    %c0_29 = arith.constant 0 : index
    %48 = vector.load %arg3[%c320, %c0_29] : memref<576x64xf32, #tpu.memory_space<vmem>>, vector<64x64xf32>
    %cst_30 = arith.constant dense<0.000000e+00> : vector<200x64xf32>
    %49 = tpu.matmul %47, %48, %cst_30 {dimension_numbers = #tpu.dot_dimension_numbers<[1], [0], [0], [1], [0, 0, 1, 1], [], []>} : vector<200x64xf32>, vector<64x64xf32>, vector<200x64xf32> -> vector<200x64xf32>
    %50 = arith.addf %42, %49 : vector<200x64xf32>
    %c16_i32_31 = arith.constant 16 : i32
    %51 = arith.addi %1, %c16_i32_31 : i32
    %c10_i32 = arith.constant 10 : i32
    %52 = arith.addi %51, %c10_i32 : i32
    %c-1_i32_32 = arith.constant -1 : i32
    %53 = arith.addi %52, %c-1_i32_32 : i32
    %54 = arith.index_cast %53 : i32 to index
    %c0_33 = arith.constant 0 : index
    %55 = vector.load %arg2[%54, %c0_33] : memref<232x64xf32, #tpu.memory_space<vmem>>, vector<200x64xf32>
    %c384 = arith.constant 384 : index
    %c0_34 = arith.constant 0 : index
    %56 = vector.load %arg3[%c384, %c0_34] : memref<576x64xf32, #tpu.memory_space<vmem>>, vector<64x64xf32>
    %cst_35 = arith.constant dense<0.000000e+00> : vector<200x64xf32>
    %57 = tpu.matmul %55, %56, %cst_35 {dimension_numbers = #tpu.dot_dimension_numbers<[1], [0], [0], [1], [0, 0, 1, 1], [], []>} : vector<200x64xf32>, vector<64x64xf32>, vector<200x64xf32> -> vector<200x64xf32>
    %58 = arith.addf %50, %57 : vector<200x64xf32>
    %c16_i32_36 = arith.constant 16 : i32
    %59 = arith.addi %1, %c16_i32_36 : i32
    %c10_i32_37 = arith.constant 10 : i32
    %60 = arith.addi %59, %c10_i32_37 : i32
    %c0_i32_38 = arith.constant 0 : i32
    %61 = arith.addi %60, %c0_i32_38 : i32
    %62 = arith.index_cast %61 : i32 to index
    %c0_39 = arith.constant 0 : index
    %63 = vector.load %arg2[%62, %c0_39] : memref<232x64xf32, #tpu.memory_space<vmem>>, vector<200x64xf32>
    %c448 = arith.constant 448 : index
    %c0_40 = arith.constant 0 : index
    %64 = vector.load %arg3[%c448, %c0_40] : memref<576x64xf32, #tpu.memory_space<vmem>>, vector<64x64xf32>
    %cst_41 = arith.constant dense<0.000000e+00> : vector<200x64xf32>
    %65 = tpu.matmul %63, %64, %cst_41 {dimension_numbers = #tpu.dot_dimension_numbers<[1], [0], [0], [1], [0, 0, 1, 1], [], []>} : vector<200x64xf32>, vector<64x64xf32>, vector<200x64xf32> -> vector<200x64xf32>
    %66 = arith.addf %58, %65 : vector<200x64xf32>
    %c16_i32_42 = arith.constant 16 : i32
    %67 = arith.addi %1, %c16_i32_42 : i32
    %c10_i32_43 = arith.constant 10 : i32
    %68 = arith.addi %67, %c10_i32_43 : i32
    %c1_i32_44 = arith.constant 1 : i32
    %69 = arith.addi %68, %c1_i32_44 : i32
    %70 = arith.index_cast %69 : i32 to index
    %c0_45 = arith.constant 0 : index
    %71 = vector.load %arg2[%70, %c0_45] : memref<232x64xf32, #tpu.memory_space<vmem>>, vector<200x64xf32>
    %c512 = arith.constant 512 : index
    %c0_46 = arith.constant 0 : index
    %72 = vector.load %arg3[%c512, %c0_46] : memref<576x64xf32, #tpu.memory_space<vmem>>, vector<64x64xf32>
    %cst_47 = arith.constant dense<0.000000e+00> : vector<200x64xf32>
    %73 = tpu.matmul %71, %72, %cst_47 {dimension_numbers = #tpu.dot_dimension_numbers<[1], [0], [0], [1], [0, 0, 1, 1], [], []>} : vector<200x64xf32>, vector<64x64xf32>, vector<200x64xf32> -> vector<200x64xf32>
    %74 = arith.addf %66, %73 : vector<200x64xf32>
    %c0_48 = arith.constant 0 : index
    %c0_49 = arith.constant 0 : index
    %75 = vector.load %arg4[%c0_48, %c0_49] : memref<1x64xf32, #tpu.memory_space<vmem>>, vector<1x64xf32>
    %76 = vector.broadcast %75 : vector<1x64xf32> to vector<200x64xf32>
    %77 = arith.addf %74, %76 : vector<200x64xf32>
    %c0_50 = arith.constant 0 : index
    %c0_51 = arith.constant 0 : index
    %78 = vector.load %arg5[%c0_50, %c0_51] : memref<200x1xf32, #tpu.memory_space<vmem>>, vector<200x1xf32>
    %79 = vector.broadcast %78 : vector<200x1xf32> to vector<200x64xf32>
    %80 = arith.mulf %77, %79 : vector<200x64xf32>
    %c0_52 = arith.constant 0 : index
    %c0_53 = arith.constant 0 : index
    %81 = vector.load %arg6[%c0_52, %c0_53] : memref<200x64xf32, #tpu.memory_space<vmem>>, vector<200x64xf32>
    tpu.vector_store %arg6[%c0_52, %c0_53], %80 {strides = array<i32>} : memref<200x64xf32, #tpu.memory_space<vmem>>, vector<200x64xf32>,
    return
  }
  func.func @transform_0(%arg0: i32, %arg1: i32) -> (i32, i32) {
    %c0_i32 = arith.constant 0 : i32
    %c0_i32_0 = arith.constant 0 : i32
    %c0_i32_1 = arith.constant 0 : i32
    return %c0_i32, %c0_i32_0 : i32, i32
  }
  func.func @transform_1(%arg0: i32, %arg1: i32) -> (i32, i32) {
    %c0_i32 = arith.constant 0 : i32
    %c0_i32_0 = arith.constant 0 : i32
    return %c0_i32, %arg1 : i32, i32
  }
  func.func @transform_2(%arg0: i32, %arg1: i32) -> (i32, i32) {
    %c0_i32 = arith.constant 0 : i32
    %c0_i32_0 = arith.constant 0 : i32
    return %c0_i32, %arg1 : i32, i32
  }
  func.func @transform_3(%arg0: i32, %arg1: i32) -> (i32, i32) {
    %c0_i32 = arith.constant 0 : i32
    %c0_i32_0 = arith.constant 0 : i32
    return %arg0, %c0_i32 : i32, i32
  }
  func.func @transform_4(%arg0: i32, %arg1: i32) -> (i32, i32) {
    %c0_i32 = arith.constant 0 : i32
    return %arg0, %arg1 : i32, i32
  }
}

</mosaic_0001>

<bundles_post_ra>
// kernel: tpu_custom_call.1
= control target key start
LH: loop header
LB: loop body
LE: loop exit
PB: predicated region body
PF: predicated region fallthrough
CT: control target
= control target key end

     0   :  { %v4727_v0 = vmov 0.0   ;;  %vm88_vm0 = vcmask 523264   ;;  %vm4728_vm1 = vmmov 0   ;;  %s6858_s1 = inlined_call_operand.vmem [shape: f32[576,64], index: 1, kind: input, shape index: {}]   ;;  %s6859_s0 = inlined_call_operand.vmem [shape: f32[232,64], index: 0, kind: input, shape index: {}]   ;;  %s6860_s3 = inlined_call_operand.vmem [shape: f32[200,1], index: 3, kind: input, shape index: {}]   ;;  %s6861_s2 = inlined_call_operand.vmem [shape: f32[1,64], index: 2, kind: input, shape index: {}]   ;;  %s6862_s4 = inlined_call_operand.vmem [shape: f32[200,64], index: 4, kind: output, shape index: {}]  }
   0x1   :  { %3887 = vmatprep.subr.mxu0 %v4727_v0  ;;  %4706 = vmatprep.subr.mxu1 %v4727_v0  ;;  %v87_v1 = vld [vmem:[%s6858_s1 + $0x78] sm:$0xff]  ;;  %v86_v2 = vld [vmem:[%s6858_s1 + $0x70] sm:$0xff]  ;;  %v85_v3 = vld [vmem:[%s6858_s1 + $0x68] sm:$0xff] }
   0x2   :  { %3888 = vmatpush3.msra.mxu0 %v87_v1  ;;  %4714 = vmatpush3.msra.mxu1 %v87_v1  ;;  %v84_v4 = vld [vmem:[%s6858_s1 + $0x60] sm:$0xff]  ;;  %v83_v5 = vld [vmem:[%s6858_s1 + $0x58] sm:$0xff]  ;;  %v82_v6 = vld [vmem:[%s6858_s1 + $0x50] sm:$0xff] }
   0x3   :  { %3889 = vmatprep.subr.mxu0 %v4727_v0  ;;  %4707 = vmatprep.subr.mxu1 %v4727_v0  ;;  %v81_v7 = vld [vmem:[%s6858_s1 + $0x48] sm:$0xff]  ;;  %v80_v8 = vld [vmem:[%s6858_s1 + $0x40] sm:$0xff]  ;;  %v653_v11 = vld [vmem:[%s6858_s1 + $0xb8] sm:$0xff] }
   0x4   :  { %3890 = vmatpush3.msra.mxu0 %v86_v2  ;;  %4715 = vmatpush3.msra.mxu1 %v86_v2  ;;  %v3164_v9 = vld [vmem:[%s6859_s0 + $0x6] sm:$0xff]  ;;  %v3177_v10 = vld [vmem:[%s6859_s0 + $0x6e] sm:$0xff]  ;;  %v52_v12 = vld [vmem:[%s6858_s1 + $0x38] sm:$0xff] }
   0x5   :  { %3891 = vmatprep.subr.mxu0 %v4727_v0  ;;  %4708 = vmatprep.subr.mxu1 %v4727_v0  ;;  %v3165_v13 = vld [vmem:[%s6859_s0 + $0xe] sm:$0xff]  ;;  %v3178_v14 = vld [vmem:[%s6859_s0 + $0x76] sm:$0xff]  ;;  %v3179_v18 = vld [vmem:[%s6859_s0 + $0x7e] sm:$0xff] }
   0x6   :  { %3892 = vmatpush3.msra.mxu0 %v85_v3  ;;  %4716 = vmatpush3.msra.mxu1 %v85_v3  ;;  %v652_v15 = vld [vmem:[%s6858_s1 + $0xb0] sm:$0xff]  ;;  %v651_v19 = vld [vmem:[%s6858_s1 + $0xa8] sm:$0xff]  ;;  %v3167_v21 = vld [vmem:[%s6859_s0 + $0x1e] sm:$0xff] }
   0x7   :  { %3893 = vmatprep.subr.mxu0 %v4727_v0  ;;  %4709 = vmatprep.subr.mxu1 %v4727_v0  ;;  %v51_v16 = vld [vmem:[%s6858_s1 + $0x30] sm:$0xff]  ;;  %v50_v20 = vld [vmem:[%s6858_s1 + $0x28] sm:$0xff]  ;;  %v49_v23 = vld [vmem:[%s6858_s1 + $0x20] sm:$0xff] }
   0x8   :  { %3894 = vmatpush3.msra.mxu0 %v84_v4  ;;  %4717 = vmatpush3.msra.mxu1 %v84_v4  ;;  %v3166_v17 = vld [vmem:[%s6859_s0 + $0x16] sm:$0xff]  ;;  %v3180_v22 = vld [vmem:[%s6859_s0 + $0x86] sm:$0xff]  ;;  %v3181_v26 = vld [vmem:[%s6859_s0 + $0x8e] sm:$0xff] }
   0x9   :  { %3895 = vmatprep.subr.mxu0 %v4727_v0  ;;  %4710 = vmatprep.subr.mxu1 %v4727_v0  ;;  %v650_v24 = vld [vmem:[%s6858_s1 + $0xa0] sm:$0xff]  ;;  %v48_v27 = vld [vmem:[%s6858_s1 + $0x18] sm:$0xff]  ;;  %v3169_v29 = vld [vmem:[%s6859_s0 + $0x2e] sm:$0xff] }
   0xa   :  { %3896 = vmatpush3.msra.mxu0 %v83_v5  ;;  %4718 = vmatpush3.msra.mxu1 %v83_v5  ;;  %v3168_v25 = vld [vmem:[%s6859_s0 + $0x26] sm:$0xff]  ;;  %v649_v28 = vld [vmem:[%s6858_s1 + $0x98] sm:$0xff]  ;;  %v47_v31 = vld [vmem:[%s6858_s1 + $0x10] sm:$0xff] }
   0xb   :  { %3897 = vmatprep.subr.mxu0 %v4727_v0  ;;  %4711 = vmatprep.subr.mxu1 %v4727_v0  ;;  %v3182_v30 = vld [vmem:[%s6859_s0 + $0x96] sm:$0xff]  ;;  %v3183_v34 = vld [vmem:[%s6859_s0 + $0x9e] sm:$0xff]  ;;  %v46_v35 = vld [vmem:[%s6858_s1 + $0x8] sm:$0xff] }
   0xc   :  { %3898 = vmatpush3.msra.mxu0 %v82_v6  ;;  %4719 = vmatpush3.msra.mxu1 %v82_v6  ;;  %v648_v32 = vld [vmem:[%s6858_s1 + $0x90] sm:$0xff]  ;;  %v647_v36 = vld [vmem:[%s6858_s1 + $0x88] sm:$0xff]  ;;  %v3171_v37 = vld [vmem:[%s6859_s0 + $0x3e] sm:$0xff] }
   0xd   :  { %3899 = vmatprep.subr.mxu0 %v4727_v0  ;;  %4712 = vmatprep.subr.mxu1 %v4727_v0  ;;  %v3170_v33 = vld [vmem:[%s6859_s0 + $0x36] sm:$0xff]  ;;  %v3184_v38 = vld [vmem:[%s6859_s0 + $0xa6] sm:$0xff]  ;;  %v3185_v42 = vld [vmem:[%s6859_s0 + $0xae] sm:$0xff] }
   0xe   :  { %3900 = vmatpush3.msra.mxu0 %v81_v7  ;;  %4720 = vmatpush3.msra.mxu1 %v81_v7  ;;  %v45_v39 = vld [vmem:[%s6858_s1] sm:$0xff]  ;;  %v3173_v43 = vld [vmem:[%s6859_s0 + $0x4e] sm:$0xff]  ;;  %v3186_v44 = vld [vmem:[%s6859_s0 + $0xb6] sm:$0xff] }
   0xf   :  { %3901 = vmatprep.subr.mxu0 %v4727_v0  ;;  %4713 = vmatprep.subr.mxu1 %v4727_v0  ;;  %v646_v40 = vld [vmem:[%s6858_s1 + $0x80] sm:$0xff]  ;;  %v3174_v45 = vld [vmem:[%s6859_s0 + $0x56] sm:$0xff]  ;;  %v3140_v52 = vld [vmem:[%s6859_s0 + $0xd] sm:$0xff] }
  0x10   :  { %3902 = vmatpush3.msra.mxu0 %v80_v8  ;;  %4721 = vmatpush3.msra.mxu1 %v80_v8  ;;  %v3172_v41 = vld [vmem:[%s6859_s0 + $0x46] sm:$0xff]  ;;  %v3187_v46 = vld [vmem:[%s6859_s0 + $0xbe] sm:$0xff]  ;;  %v977_v55 = vld [vmem:[%s6858_s1 + $0xf0] sm:$0xff] }
  0x11   :  { %3903 = vmatprep.mubr.msk.f32.mxu0 %vm4728_vm1, %v4727_v0  ;;  %3942 = vmatprep.mubr.msk.f32.mxu1 %vm4728_vm1, %v4727_v0  ;;  %v3175_v47 = vld [vmem:[%s6859_s0 + $0x5e] sm:$0xff]  ;;  %v3188_v48 = vld [vmem:[%s6859_s0 + $0xc6] sm:$0xff]  ;;  %v3141_v56 = vld [vmem:[%s6859_s0 + $0x15] sm:$0xff] }
  0x12   :  { %3904 = vmatmul.mubr.msk.f32.vlgmr.msra.gmra.mxu0 %vm88_vm0, %v3164_v9  ;;  %3943 = vmatmul.mubr.msk.f32.vlgmr.msra.gmra.mxu1 %vm88_vm0, %v3177_v10  ;;  %v3176_v49 = vld [vmem:[%s6859_s0 + $0x66] sm:$0xff]  ;;  %v978_v51 = vld [vmem:[%s6858_s1 + $0xf8] sm:$0xff]  ;;  %v5047_v57 = vld [vmem:[%s6859_s0 + $0xf] sm:$0xff] }
  0x13   :  { %4069 = vmatprep.subr.mxu0 %v4727_v0  ;;  %3978 = vmatprep.subr.mxu1 %v4727_v0  ;;  %v3139_v50 = vld [vmem:[%s6859_s0 + $0x5] sm:$0xff]  ;;  %v1303_v54 = vld [vmem:[%s6858_s1 + $0x138] sm:$0xff]  ;;  %v1302_v58 = vld [vmem:[%s6858_s1 + $0x130] sm:$0xff] }
  0x14   :  { %4070 = vmatpush3.msra.mxu0 %v653_v11  ;;  %3906 = vmatprep.mubr.msk.f32.mxu0 %vm4728_vm1, %v4727_v0  ;;  %v3239_v53 = vld [vmem:[%s6859_s0 + $0x7] sm:$0xff]  ;;  %v3142_v60 = vld [vmem:[%s6859_s0 + $0x1d] sm:$0xff]  ;;  %v973_v8 = vld [vmem:[%s6858_s1 + $0xd0] sm:$0xff] }
  0x15   :  { %3945 = vmatprep.mubr.msk.f32.mxu1 %vm4728_vm1, %v4727_v0  ;;  %3979 = vmatpush3.msra.mxu1 %v52_v12  ;;  %v976_v59 = vld [vmem:[%s6858_s1 + $0xe8] sm:$0xff]  ;;  %v5072_v61 = vld [vmem:[%s6859_s0 + $0x17] sm:$0xff]  ;;  %v975_v63 = vld [vmem:[%s6858_s1 + $0xe0] sm:$0xff] }
  0x16   :  { %3907 = vmatmul.mubr.msk.f32.gmra.mxu0 %vm88_vm0, %v3165_v13  ;;  %3946 = vmatmul.mubr.msk.f32.gmra.mxu1 %vm88_vm0, %v3178_v14  ;;  %v1301_v62 = vld [vmem:[%s6858_s1 + $0x128] sm:$0xff]  ;;  %v5095_v2 = vld [vmem:[%s6859_s0 + $0x1f] sm:$0xff]  ;;  %v3145_v9 = vld [vmem:[%s6859_s0 + $0x35] sm:$0xff] }
  0x17   :  { %3909 = vmatprep.mubr.msk.f32.mxu0 %vm4728_vm1, %v4727_v0  ;;  %3948 = vmatprep.mubr.msk.f32.mxu1 %vm4728_vm1, %v4727_v0  ;;  %v3143_v1 = vld [vmem:[%s6859_s0 + $0x25] sm:$0xff]  ;;  %v974_v4 = vld [vmem:[%s6858_s1 + $0xd8] sm:$0xff]  ;;  %v3144_v5 = vld [vmem:[%s6859_s0 + $0x2d] sm:$0xff] }
  0x18   :  { %4071 = vmatprep.subr.mxu0 %v4727_v0  ;;  %3980 = vmatprep.subr.mxu1 %v4727_v0  ;;  %v1300_v3 = vld [vmem:[%s6858_s1 + $0x120] sm:$0xff]  ;;  %v1299_v7 = vld [vmem:[%s6858_s1 + $0x118] sm:$0xff]  ;;  %v5141_v10 = vld [vmem:[%s6859_s0 + $0x2f] sm:$0xff] }
  0x19   :  { %4072 = vmatpush3.msra.mxu0 %v652_v15  ;;  %3981 = vmatpush3.msra.mxu1 %v51_v16  ;;  %v5118_v6 = vld [vmem:[%s6859_s0 + $0x27] sm:$0xff]  ;;  %v1298_v11 = vld [vmem:[%s6858_s1 + $0x110] sm:$0xff]  ;;  %v3146_v13 = vld [vmem:[%s6859_s0 + $0x3d] sm:$0xff] }
  0x1a   :  { %3910 = vmatmul.mubr.msk.f32.gmra.mxu0 %vm88_vm0, %v3166_v17  ;;  %3949 = vmatmul.mubr.msk.f32.gmra.mxu1 %vm88_vm0, %v3179_v18  ;;  %v972_v12 = vld [vmem:[%s6858_s1 + $0xc8] sm:$0xff]  ;;  %v5164_v14 = vld [vmem:[%s6859_s0 + $0x37] sm:$0xff]  ;;  %v971_v16 = vld [vmem:[%s6858_s1 + $0xc0] sm:$0xff] }
  0x1b   :  { %3912 = vmatprep.mubr.msk.f32.mxu0 %vm4728_vm1, %v4727_v0  ;;  %3951 = vmatprep.mubr.msk.f32.mxu1 %vm4728_vm1, %v4727_v0  ;;  %v1297_v15 = vld [vmem:[%s6858_s1 + $0x108] sm:$0xff]  ;;  %v5187_v18 = vld [vmem:[%s6859_s0 + $0x3f] sm:$0xff] }
  0x1c   :  { %4073 = vmatprep.subr.mxu0 %v4727_v0  ;;  %3982 = vmatprep.subr.mxu1 %v4727_v0  ;;  %v3147_v17 = vld [vmem:[%s6859_s0 + $0x45] sm:$0xff] }
  0x1d   :  { %4074 = vmatpush3.msra.mxu0 %v651_v19  ;;  %3983 = vmatpush3.msra.mxu1 %v50_v20  ;;  %v1296_v19 = vld [vmem:[%s6858_s1 + $0x100] sm:$0xff]  ;;  %v3148_v20 = vld [vmem:[%s6859_s0 + $0x4d] sm:$0xff] }
  0x1e   :  { %3913 = vmatmul.mubr.msk.f32.gmra.mxu0 %vm88_vm0, %v3167_v21  ;;  %3952 = vmatmul.mubr.msk.f32.gmra.mxu1 %vm88_vm0, %v3180_v22  ;;  %v5207_v21 = vld [vmem:[%s6859_s0 + $0x47] sm:$0xff]  ;;  %v3149_v22 = vld [vmem:[%s6859_s0 + $0x55] sm:$0xff] }
  0x1f   :  { %3915 = vmatprep.mubr.msk.f32.mxu0 %vm4728_vm1, %v4727_v0  ;;  %3954 = vmatprep.mubr.msk.f32.mxu1 %vm4728_vm1, %v4727_v0 }
  0x20   :  { %3984 = vmatprep.subr.mxu1 %v4727_v0  ;;  %4075 = vmatprep.subr.mxu0 %v4727_v0 }
  0x21   :  { %3985 = vmatpush3.msra.mxu1 %v49_v23  ;;  %4076 = vmatpush3.msra.mxu0 %v650_v24  ;;  %v5223_v23 = vld [vmem:[%s6859_s0 + $0x4f] sm:$0xff]  ;;  %v3150_v24 = vld [vmem:[%s6859_s0 + $0x5d] sm:$0xff] }
  0x22   :  { %3916 = vmatmul.mubr.msk.f32.gmra.mxu0 %vm88_vm0, %v3168_v25  ;;  %3955 = vmatmul.mubr.msk.f32.gmra.mxu1 %vm88_vm0, %v3181_v26  ;;  %v5238_v25 = vld [vmem:[%s6859_s0 + $0x57] sm:$0xff]  ;;  %v3151_v26 = vld [vmem:[%s6859_s0 + $0x65] sm:$0xff] }
  0x23   :  { %3918 = vmatprep.mubr.msk.f32.mxu0 %vm4728_vm1, %v4727_v0  ;;  %3957 = vmatprep.mubr.msk.f32.mxu1 %vm4728_vm1, %v4727_v0 }
  0x24   :  { %3986 = vmatprep.subr.mxu1 %v4727_v0  ;;  %4077 = vmatprep.subr.mxu0 %v4727_v0 }
  0x25   :  { %3987 = vmatpush3.msra.mxu1 %v48_v27  ;;  %4078 = vmatpush3.msra.mxu0 %v649_v28  ;;  %v5253_v27 = vld [vmem:[%s6859_s0 + $0x5f] sm:$0xff]  ;;  %v3152_v28 = vld [vmem:[%s6859_s0 + $0x6d] sm:$0xff] }
  0x26   :  { %3919 = vmatmul.mubr.msk.f32.gmra.mxu0 %vm88_vm0, %v3169_v29  ;;  %3958 = vmatmul.mubr.msk.f32.gmra.mxu1 %vm88_vm0, %v3182_v30  ;;  %v5268_v29 = vld [vmem:[%s6859_s0 + $0x67] sm:$0xff]  ;;  %v3153_v30 = vld [vmem:[%s6859_s0 + $0x75] sm:$0xff] }
  0x27   :  { %3921 = vmatprep.mubr.msk.f32.mxu0 %vm4728_vm1, %v4727_v0  ;;  %3960 = vmatprep.mubr.msk.f32.mxu1 %vm4728_vm1, %v4727_v0 }
  0x28   :  { %3988 = vmatprep.subr.mxu1 %v4727_v0  ;;  %4079 = vmatprep.subr.mxu0 %v4727_v0 }
  0x29   :  { %3989 = vmatpush3.msra.mxu1 %v47_v31  ;;  %4080 = vmatpush3.msra.mxu0 %v648_v32  ;;  %v5283_v31 = vld [vmem:[%s6859_s0 + $0x6f] sm:$0xff]  ;;  %v3154_v32 = vld [vmem:[%s6859_s0 + $0x7d] sm:$0xff] }
  0x2a   :  { %3922 = vmatmul.mubr.msk.f32.gmra.mxu0 %vm88_vm0, %v3170_v33  ;;  %3961 = vmatmul.mubr.msk.f32.gmra.mxu1 %vm88_vm0, %v3183_v34  ;;  %v5298_v33 = vld [vmem:[%s6859_s0 + $0x77] sm:$0xff]  ;;  %v3155_v34 = vld [vmem:[%s6859_s0 + $0x85] sm:$0xff] }
  0x2b   :  { %3924 = vmatprep.mubr.msk.f32.mxu0 %vm4728_vm1, %v4727_v0  ;;  %3963 = vmatprep.mubr.msk.f32.mxu1 %vm4728_vm1, %v4727_v0 }
  0x2c   :  { %3990 = vmatprep.subr.mxu1 %v4727_v0  ;;  %4081 = vmatprep.subr.mxu0 %v4727_v0 }
  0x2d   :  { %3991 = vmatpush3.msra.mxu1 %v46_v35  ;;  %4082 = vmatpush3.msra.mxu0 %v647_v36  ;;  %v5313_v35 = vld [vmem:[%s6859_s0 + $0x7f] sm:$0xff]  ;;  %v3156_v36 = vld [vmem:[%s6859_s0 + $0x8d] sm:$0xff] }
  0x2e   :  { %3925 = vmatmul.mubr.msk.f32.gmra.mxu0 %vm88_vm0, %v3171_v37  ;;  %3964 = vmatmul.mubr.msk.f32.gmra.mxu1 %vm88_vm0, %v3184_v38  ;;  %v5328_v37 = vld [vmem:[%s6859_s0 + $0x87] sm:$0xff]  ;;  %v3157_v38 = vld [vmem:[%s6859_s0 + $0x95] sm:$0xff] }
  0x2f   :  { %3927 = vmatprep.mubr.msk.f32.mxu0 %vm4728_vm1, %v4727_v0  ;;  %3966 = vmatprep.mubr.msk.f32.mxu1 %vm4728_vm1, %v4727_v0 }
  0x30   :  { %3992 = vmatprep.subr.mxu1 %v4727_v0  ;;  %4083 = vmatprep.subr.mxu0 %v4727_v0 }
  0x31   :  { %3993 = vmatpush3.msra.mxu1 %v45_v39  ;;  %4084 = vmatpush3.msra.mxu0 %v646_v40  ;;  %v5343_v39 = vld [vmem:[%s6859_s0 + $0x8f] sm:$0xff]  ;;  %v3158_v40 = vld [vmem:[%s6859_s0 + $0x9d] sm:$0xff] }
  0x32   :  { %3928 = vmatmul.mubr.msk.f32.gmra.mxu0 %vm88_vm0, %v3172_v41  ;;  %3967 = vmatmul.mubr.msk.f32.gmra.mxu1 %vm88_vm0, %v3185_v42  ;;  %v5358_v41 = vld [vmem:[%s6859_s0 + $0x97] sm:$0xff]  ;;  %v3159_v42 = vld [vmem:[%s6859_s0 + $0xa5] sm:$0xff] }
  0x33   :  { %3930 = vmatprep.mubr.msk.f32.mxu0 %vm4728_vm1, %v4727_v0  ;;  %3969 = vmatprep.mubr.msk.f32.mxu1 %vm4728_vm1, %v4727_v0 }
  0x34   :  { %4160 = vmatprep.subr.mxu1 %v4727_v0  ;;  %4251 = vmatprep.subr.mxu0 %v4727_v0 }
  0x36   :  { %3931 = vmatmul.mubr.msk.f32.gmra.mxu0 %vm88_vm0, %v3173_v43  ;;  %3970 = vmatmul.mubr.msk.f32.gmra.mxu1 %vm88_vm0, %v3186_v44  ;;  %v5373_v43 = vld [vmem:[%s6859_s0 + $0x9f] sm:$0xff]  ;;  %v3160_v44 = vld [vmem:[%s6859_s0 + $0xad] sm:$0xff] }
  0x37   :  { %3933 = vmatprep.mubr.msk.f32.mxu0 %vm4728_vm1, %v4727_v0  ;;  %3972 = vmatprep.mubr.msk.f32.mxu1 %vm4728_vm1, %v4727_v0 }
  0x3a   :  { %3934 = vmatmul.mubr.msk.f32.gmra.mxu0 %vm88_vm0, %v3174_v45  ;;  %3973 = vmatmul.mubr.msk.f32.gmra.mxu1 %vm88_vm0, %v3187_v46  ;;  %v5388_v45 = vld [vmem:[%s6859_s0 + $0xa7] sm:$0xff]  ;;  %v3161_v46 = vld [vmem:[%s6859_s0 + $0xb5] sm:$0xff] }
  0x3b   :  { %3936 = vmatprep.mubr.msk.f32.mxu0 %vm4728_vm1, %v4727_v0  ;;  %3975 = vmatprep.mubr.msk.f32.mxu1 %vm4728_vm1, %v4727_v0 }
  0x3e   :  { %3937 = vmatmul.mubr.msk.f32.gmra.mxu0 %vm88_vm0, %v3175_v47  ;;  %3976 = vmatmul.mubr.msk.f32.gmra.mxu1 %vm88_vm0, %v3188_v48  ;;  %v5403_v47 = vld [vmem:[%s6859_s0 + $0xaf] sm:$0xff]  ;;  %v3162_v48 = vld [vmem:[%s6859_s0 + $0xbd] sm:$0xff] }
  0x3f   :  { %3939 = vmatprep.mubr.msk.f32.mxu0 %vm4728_vm1, %v4727_v0  ;;  %3994 = vmatprep.mubr.msk.f32.mxu1 %vm4728_vm1, %v4727_v0 }
  0x42   :  { %3940 = vmatmul.mubr.msk.f32.gmra.mxu0 %vm88_vm0, %v3176_v49  ;;  %3995 = vmatmul.mubr.msk.f32.vlgmr.msra.gmra.mxu1 %vm88_vm0, %v3139_v50  ;;  %v5418_v49 = vld [vmem:[%s6859_s0 + $0xb7] sm:$0xff]  ;;  %v3163_v50 = vld [vmem:[%s6859_s0 + $0xc5] sm:$0xff] }
  0x43   :  { %3997 = vmatprep.mubr.msk.f32.mxu1 %vm4728_vm1, %v4727_v0  ;;  %4085 = vmatprep.mubr.msk.f32.mxu0 %vm4728_vm1, %v4727_v0 }
  0x44   :  { %4161 = vmatpush3.msra.mxu1 %v978_v51  ;;  %v5433_v51 = vld [vmem:[%s6859_s0 + $0xbf] sm:$0xff] }
  0x45   :  { %4162 = vmatprep.subr.mxu1 %v4727_v0 }
  0x46   :  { %3998 = vmatmul.mubr.msk.f32.gmra.mxu1 %vm88_vm0, %v3140_v52  ;;  %4086 = vmatmul.mubr.msk.f32.vlgmr.msra.gmra.mxu0 %vm88_vm0, %v3239_v53  ;;  %v5445_v52 = vld [vmem:[%s6859_s0 + $0xc7] sm:$0xff]  ;;  %v1628_v53 = vld [vmem:[%s6858_s1 + $0x178] sm:$0xff] }
  0x47   :  { %4252 = vmatpush3.msra.mxu0 %v1303_v54  ;;  %4000 = vmatprep.mubr.msk.f32.mxu1 %vm4728_vm1, %v4727_v0  ;;  %v3339_v54 = vld [vmem:[%s6859_s0 + $0x10] sm:$0xff] }
  0x48   :  { %4088 = vmatprep.mubr.msk.f32.mxu0 %vm4728_vm1, %v4727_v0  ;;  %4163 = vmatpush3.msra.mxu1 %v977_v55  ;;  %v1953_v55 = vld [vmem:[%s6858_s1 + $0x1b8] sm:$0xff] }
  0x49   :  { %4253 = vmatprep.subr.mxu0 %v4727_v0  ;;  %4164 = vmatprep.subr.mxu1 %v4727_v0 }
  0x4a   :  { %4001 = vmatmul.mubr.msk.f32.gmra.mxu1 %vm88_vm0, %v3141_v56  ;;  %4089 = vmatmul.mubr.msk.f32.gmra.mxu0 %vm88_vm0, %v5047_v57  ;;  %v1627_v56 = vld [vmem:[%s6858_s1 + $0x170] sm:$0xff] }
  0x4b   :  { %4003 = vmatprep.mubr.msk.f32.mxu1 %vm4728_vm1, %v4727_v0  ;;  %4091 = vmatprep.mubr.msk.f32.mxu0 %vm4728_vm1, %v4727_v0 }
  0x4c   :  { %4254 = vmatpush3.msra.mxu0 %v1302_v58  ;;  %4165 = vmatpush3.msra.mxu1 %v976_v59  ;;  %v1952_v58 = vld [vmem:[%s6858_s1 + $0x1b0] sm:$0xff]  ;;  %v1626_v59 = vld [vmem:[%s6858_s1 + $0x168] sm:$0xff] }
  0x4d   :  { %4255 = vmatprep.subr.mxu0 %v4727_v0  ;;  %4166 = vmatprep.subr.mxu1 %v4727_v0 }
  0x4e   :  { %4004 = vmatmul.mubr.msk.f32.gmra.mxu1 %vm88_vm0, %v3142_v60  ;;  %4092 = vmatmul.mubr.msk.f32.gmra.mxu0 %vm88_vm0, %v5072_v61  ;;  %v3341_v60 = vld [vmem:[%s6859_s0 + $0x20] sm:$0xff] }
  0x4f   :  { %4006 = vmatprep.mubr.msk.f32.mxu1 %vm4728_vm1, %v4727_v0  ;;  %4094 = vmatprep.mubr.msk.f32.mxu0 %vm4728_vm1, %v4727_v0 }
  0x50   :  { %4256 = vmatpush3.msra.mxu0 %v1301_v62  ;;  %4167 = vmatpush3.msra.mxu1 %v975_v63  ;;  %v1625_v62 = vld [vmem:[%s6858_s1 + $0x160] sm:$0xff]  ;;  %v3342_v63 = vld [vmem:[%s6859_s0 + $0x28] sm:$0xff] }
  0x51   :  { %4257 = vmatprep.subr.mxu0 %v4727_v0  ;;  %4168 = vmatprep.subr.mxu1 %v4727_v0 }
  0x52   :  { %4007 = vmatmul.mubr.msk.f32.gmra.mxu1 %vm88_vm0, %v3143_v1  ;;  %4095 = vmatmul.mubr.msk.f32.gmra.mxu0 %vm88_vm0, %v5095_v2  ;;  %v1950_v1 = vld [vmem:[%s6858_s1 + $0x1a0] sm:$0xff] }
  0x53   :  { %4009 = vmatprep.mubr.msk.f32.mxu1 %vm4728_vm1, %v4727_v0  ;;  %4097 = vmatprep.mubr.msk.f32.mxu0 %vm4728_vm1, %v4727_v0 }
  0x54   :  { %4258 = vmatpush3.msra.mxu0 %v1300_v3  ;;  %4169 = vmatpush3.msra.mxu1 %v974_v4  ;;  %v3343_v3 = vld [vmem:[%s6859_s0 + $0x30] sm:$0xff]  ;;  %v1949_v4 = vld [vmem:[%s6858_s1 + $0x198] sm:$0xff] }
  0x55   :  { %4259 = vmatprep.subr.mxu0 %v4727_v0  ;;  %4170 = vmatprep.subr.mxu1 %v4727_v0 }
  0x56   :  { %4010 = vmatmul.mubr.msk.f32.gmra.mxu1 %vm88_vm0, %v3144_v5  ;;  %4098 = vmatmul.mubr.msk.f32.gmra.mxu0 %vm88_vm0, %v5118_v6  ;;  %v1623_v5 = vld [vmem:[%s6858_s1 + $0x150] sm:$0xff] }
  0x57   :  { %4012 = vmatprep.mubr.msk.f32.mxu1 %vm4728_vm1, %v4727_v0  ;;  %4100 = vmatprep.mubr.msk.f32.mxu0 %vm4728_vm1, %v4727_v0 }
  0x58   :  { %4260 = vmatpush3.msra.mxu0 %v1299_v7  ;;  %4171 = vmatpush3.msra.mxu1 %v973_v8  ;;  %v1948_v7 = vld [vmem:[%s6858_s1 + $0x190] sm:$0xff]  ;;  %v1622_v8 = vld [vmem:[%s6858_s1 + $0x148] sm:$0xff] }
  0x59   :  { %4261 = vmatprep.subr.mxu0 %v4727_v0  ;;  %4172 = vmatprep.subr.mxu1 %v4727_v0 }
  0x5a   :  { %4013 = vmatmul.mubr.msk.f32.gmra.mxu1 %vm88_vm0, %v3145_v9  ;;  %4101 = vmatmul.mubr.msk.f32.gmra.mxu0 %vm88_vm0, %v5141_v10  ;;  %v3345_v9 = vld [vmem:[%s6859_s0 + $0x40] sm:$0xff] }
  0x5b   :  { %4015 = vmatprep.mubr.msk.f32.mxu1 %vm4728_vm1, %v4727_v0  ;;  %4103 = vmatprep.mubr.msk.f32.mxu0 %vm4728_vm1, %v4727_v0 }
  0x5c   :  { %4262 = vmatpush3.msra.mxu0 %v1298_v11  ;;  %4173 = vmatpush3.msra.mxu1 %v972_v12  ;;  %v1621_v11 = vld [vmem:[%s6858_s1 + $0x140] sm:$0xff]  ;;  %v3346_v12 = vld [vmem:[%s6859_s0 + $0x48] sm:$0xff] }
  0x5d   :  { %4263 = vmatprep.subr.mxu0 %v4727_v0  ;;  %4174 = vmatprep.subr.mxu1 %v4727_v0 }
  0x5e   :  { %4016 = vmatmul.mubr.msk.f32.gmra.mxu1 %vm88_vm0, %v3146_v13  ;;  %4104 = vmatmul.mubr.msk.f32.gmra.mxu0 %vm88_vm0, %v5164_v14  ;;  %v1946_v13 = vld [vmem:[%s6858_s1 + $0x180] sm:$0xff] }
  0x5f   :  { %4018 = vmatprep.mubr.msk.f32.mxu1 %vm4728_vm1, %v4727_v0  ;;  %4106 = vmatprep.mubr.msk.f32.mxu0 %vm4728_vm1, %v4727_v0 }
  0x60   :  { %4264 = vmatpush3.msra.mxu0 %v1297_v15  ;;  %4175 = vmatpush3.msra.mxu1 %v971_v16  ;;  %v3348_v15 = vld [vmem:[%s6859_s0 + $0x58] sm:$0xff]  ;;  %v3349_v16 = vld [vmem:[%s6859_s0 + $0x60] sm:$0xff] }
  0x61   :  { %4265 = vmatprep.subr.mxu0 %v4727_v0  ;;  %4342 = vmatprep.subr.mxu1 %v4727_v0 }
  0x62   :  { %4019 = vmatmul.mubr.msk.f32.gmra.mxu1 %vm88_vm0, %v3147_v17  ;;  %4107 = vmatmul.mubr.msk.f32.gmra.mxu0 %vm88_vm0, %v5187_v18 }
  0x63   :  { %4021 = vmatprep.mubr.msk.f32.mxu1 %vm4728_vm1, %v4727_v0  ;;  %4109 = vmatprep.mubr.msk.f32.mxu0 %vm4728_vm1, %v4727_v0 }
  0x64   :  { %4266 = vmatpush3.msra.mxu0 %v1296_v19  ;;  %v3350_v19 = vld [vmem:[%s6859_s0 + $0x68] sm:$0xff] }
  0x65   :  { %4433 = vmatprep.subr.mxu0 %v4727_v0 }
  0x66   :  { %4022 = vmatmul.mubr.msk.f32.gmra.mxu1 %vm88_vm0, %v3148_v20  ;;  %4110 = vmatmul.mubr.msk.f32.gmra.mxu0 %vm88_vm0, %v5207_v21 }
  0x67   :  { %4024 = vmatprep.mubr.msk.f32.mxu1 %vm4728_vm1, %v4727_v0  ;;  %4112 = vmatprep.mubr.msk.f32.mxu0 %vm4728_vm1, %v4727_v0 }
  0x6a   :  { %4025 = vmatmul.mubr.msk.f32.gmra.mxu1 %vm88_vm0, %v3149_v22  ;;  %4113 = vmatmul.mubr.msk.f32.gmra.mxu0 %vm88_vm0, %v5223_v23 }
  0x6b   :  { %4027 = vmatprep.mubr.msk.f32.mxu1 %vm4728_vm1, %v4727_v0  ;;  %4115 = vmatprep.mubr.msk.f32.mxu0 %vm4728_vm1, %v4727_v0 }
  0x6e   :  { %4028 = vmatmul.mubr.msk.f32.gmra.mxu1 %vm88_vm0, %v3150_v24  ;;  %4116 = vmatmul.mubr.msk.f32.gmra.mxu0 %vm88_vm0, %v5238_v25  ;;  %v3351_v24 = vld [vmem:[%s6859_s0 + $0x70] sm:$0xff] }
  0x6f   :  { %4030 = vmatprep.mubr.msk.f32.mxu1 %vm4728_vm1, %v4727_v0  ;;  %4118 = vmatprep.mubr.msk.f32.mxu0 %vm4728_vm1, %v4727_v0 }
  0x72   :  { %4031 = vmatmul.mubr.msk.f32.gmra.mxu1 %vm88_vm0, %v3151_v26  ;;  %4119 = vmatmul.mubr.msk.f32.gmra.mxu0 %vm88_vm0, %v5253_v27 }
  0x73   :  { %4033 = vmatprep.mubr.msk.f32.mxu1 %vm4728_vm1, %v4727_v0  ;;  %4121 = vmatprep.mubr.msk.f32.mxu0 %vm4728_vm1, %v4727_v0 }
  0x76   :  { %4034 = vmatmul.mubr.msk.f32.gmra.mxu1 %vm88_vm0, %v3152_v28  ;;  %4122 = vmatmul.mubr.msk.f32.gmra.mxu0 %vm88_vm0, %v5268_v29 }
  0x77   :  { %4036 = vmatprep.mubr.msk.f32.mxu1 %vm4728_vm1, %v4727_v0  ;;  %4124 = vmatprep.mubr.msk.f32.mxu0 %vm4728_vm1, %v4727_v0 }
  0x7a   :  { %4037 = vmatmul.mubr.msk.f32.gmra.mxu1 %vm88_vm0, %v3153_v30  ;;  %4125 = vmatmul.mubr.msk.f32.gmra.mxu0 %vm88_vm0, %v5283_v31 }
  0x7b   :  { %4039 = vmatprep.mubr.msk.f32.mxu1 %vm4728_vm1, %v4727_v0  ;;  %4127 = vmatprep.mubr.msk.f32.mxu0 %vm4728_vm1, %v4727_v0 }
  0x7e   :  { %4040 = vmatmul.mubr.msk.f32.gmra.mxu1 %vm88_vm0, %v3154_v32  ;;  %4128 = vmatmul.mubr.msk.f32.gmra.mxu0 %vm88_vm0, %v5298_v33 }
  0x7f   :  { %4042 = vmatprep.mubr.msk.f32.mxu1 %vm4728_vm1, %v4727_v0  ;;  %4130 = vmatprep.mubr.msk.f32.mxu0 %vm4728_vm1, %v4727_v0 }
  0x82   :  { %4043 = vmatmul.mubr.msk.f32.gmra.mxu1 %vm88_vm0, %v3155_v34  ;;  %4131 = vmatmul.mubr.msk.f32.gmra.mxu0 %vm88_vm0, %v5313_v35 }
  0x83   :  { %4045 = vmatprep.mubr.msk.f32.mxu1 %vm4728_vm1, %v4727_v0  ;;  %4133 = vmatprep.mubr.msk.f32.mxu0 %vm4728_vm1, %v4727_v0 }
  0x86   :  { %4046 = vmatmul.mubr.msk.f32.gmra.mxu1 %vm88_vm0, %v3156_v36  ;;  %4134 = vmatmul.mubr.msk.f32.gmra.mxu0 %vm88_vm0, %v5328_v37 }
  0x87   :  { %4048 = vmatprep.mubr.msk.f32.mxu1 %vm4728_vm1, %v4727_v0  ;;  %4136 = vmatprep.mubr.msk.f32.mxu0 %vm4728_vm1, %v4727_v0 }
  0x8a   :  { %4049 = vmatmul.mubr.msk.f32.gmra.mxu1 %vm88_vm0, %v3157_v38  ;;  %4137 = vmatmul.mubr.msk.f32.gmra.mxu0 %vm88_vm0, %v5343_v39 }
  0x8b   :  { %4051 = vmatprep.mubr.msk.f32.mxu1 %vm4728_vm1, %v4727_v0  ;;  %4139 = vmatprep.mubr.msk.f32.mxu0 %vm4728_vm1, %v4727_v0 }
  0x8e   :  { %4052 = vmatmul.mubr.msk.f32.gmra.mxu1 %vm88_vm0, %v3158_v40  ;;  %4140 = vmatmul.mubr.msk.f32.gmra.mxu0 %vm88_vm0, %v5358_v41 }
  0x8f   :  { %4054 = vmatprep.mubr.msk.f32.mxu1 %vm4728_vm1, %v4727_v0  ;;  %4142 = vmatprep.mubr.msk.f32.mxu0 %vm4728_vm1, %v4727_v0 }
  0x92   :  { %4055 = vmatmul.mubr.msk.f32.gmra.mxu1 %vm88_vm0, %v3159_v42  ;;  %4143 = vmatmul.mubr.msk.f32.gmra.mxu0 %vm88_vm0, %v5373_v43 }
  0x93   :  { %4057 = vmatprep.mubr.msk.f32.mxu1 %vm4728_vm1, %v4727_v0  ;;  %4145 = vmatprep.mubr.msk.f32.mxu0 %vm4728_vm1, %v4727_v0 }
  0x96   :  { %4058 = vmatmul.mubr.msk.f32.gmra.mxu1 %vm88_vm0, %v3160_v44  ;;  %4146 = vmatmul.mubr.msk.f32.gmra.mxu0 %vm88_vm0, %v5388_v45 }
  0x97   :  { %4060 = vmatprep.mubr.msk.f32.mxu1 %vm4728_vm1, %v4727_v0  ;;  %4148 = vmatprep.mubr.msk.f32.mxu0 %vm4728_vm1, %v4727_v0 }
  0x9a   :  { %4061 = vmatmul.mubr.msk.f32.gmra.mxu1 %vm88_vm0, %v3161_v46  ;;  %4149 = vmatmul.mubr.msk.f32.gmra.mxu0 %vm88_vm0, %v5403_v47 }
  0x9b   :  { %4063 = vmatprep.mubr.msk.f32.mxu1 %vm4728_vm1, %v4727_v0  ;;  %4151 = vmatprep.mubr.msk.f32.mxu0 %vm4728_vm1, %v4727_v0 }
  0x9e   :  { %4064 = vmatmul.mubr.msk.f32.gmra.mxu1 %vm88_vm0, %v3162_v48  ;;  %4152 = vmatmul.mubr.msk.f32.gmra.mxu0 %vm88_vm0, %v5418_v49 }
  0x9f   :  { %4066 = vmatprep.mubr.msk.f32.mxu1 %vm4728_vm1, %v4727_v0  ;;  %4154 = vmatprep.mubr.msk.f32.mxu0 %vm4728_vm1, %v4727_v0 }
  0xa2   :  { %4067 = vmatmul.mubr.msk.f32.gmra.mxu1 %vm88_vm0, %v3163_v50  ;;  %4155 = vmatmul.mubr.msk.f32.gmra.mxu0 %vm88_vm0, %v5433_v51 }
  0xa3   :  { %4157 = vmatprep.mubr.msk.f32.mxu0 %vm4728_vm1, %v4727_v0  ;;  %4176 = vmatprep.mubr.msk.f32.mxu1 %vm4728_vm1, %v4727_v0 }
  0xa6   :  { %4158 = vmatmul.mubr.msk.f32.gmra.mxu0 %vm88_vm0, %v5445_v52  ;;  %4177 = vmatmul.mubr.msk.f32.vlgmr.msra.gmra.mxu1 %vm88_vm0, %v5047_v57  ;;  %v3340_v57 = vld [vmem:[%s6859_s0 + $0x18] sm:$0xff] }
  0xa7   :  { %4179 = vmatprep.mubr.msk.f32.mxu1 %vm4728_vm1, %v4727_v0  ;;  %4267 = vmatprep.mubr.msk.f32.mxu0 %vm4728_vm1, %v4727_v0 }
  0xa8   :  { %4343 = vmatpush3.msra.mxu1 %v1628_v53 }
  0xa9   :  { %4344 = vmatprep.subr.mxu1 %v4727_v0 }
  0xaa   :  { %4180 = vmatmul.mubr.msk.f32.gmra.mxu1 %vm88_vm0, %v5072_v61  ;;  %4268 = vmatmul.mubr.msk.f32.vlgmr.msra.gmra.mxu0 %vm88_vm0, %v3339_v54  ;;  %v1951_v61 = vld [vmem:[%s6858_s1 + $0x1a8] sm:$0xff] }
  0xab   :  { %4434 = vmatpush3.msra.mxu0 %v1953_v55  ;;  %4182 = vmatprep.mubr.msk.f32.mxu1 %vm4728_vm1, %v4727_v0 }
  0xac   :  { %4270 = vmatprep.mubr.msk.f32.mxu0 %vm4728_vm1, %v4727_v0  ;;  %4345 = vmatpush3.msra.mxu1 %v1627_v56 }
  0xad   :  { %4435 = vmatprep.subr.mxu0 %v4727_v0  ;;  %4346 = vmatprep.subr.mxu1 %v4727_v0 }
  0xae   :  { %4183 = vmatmul.mubr.msk.f32.gmra.mxu1 %vm88_vm0, %v5095_v2  ;;  %4271 = vmatmul.mubr.msk.f32.gmra.mxu0 %vm88_vm0, %v3340_v57  ;;  %v1624_v2 = vld [vmem:[%s6858_s1 + $0x158] sm:$0xff] }
  0xaf   :  { %4185 = vmatprep.mubr.msk.f32.mxu1 %vm4728_vm1, %v4727_v0  ;;  %4273 = vmatprep.mubr.msk.f32.mxu0 %vm4728_vm1, %v4727_v0 }
  0xb0   :  { %4436 = vmatpush3.msra.mxu0 %v1952_v58  ;;  %4347 = vmatpush3.msra.mxu1 %v1626_v59 }
  0xb1   :  { %4437 = vmatprep.subr.mxu0 %v4727_v0  ;;  %4348 = vmatprep.subr.mxu1 %v4727_v0 }
  0xb2   :  { %4186 = vmatmul.mubr.msk.f32.gmra.mxu1 %vm88_vm0, %v5118_v6  ;;  %4274 = vmatmul.mubr.msk.f32.gmra.mxu0 %vm88_vm0, %v3341_v60  ;;  %v3344_v6 = vld [vmem:[%s6859_s0 + $0x38] sm:$0xff] }
  0xb3   :  { %4188 = vmatprep.mubr.msk.f32.mxu1 %vm4728_vm1, %v4727_v0  ;;  %4276 = vmatprep.mubr.msk.f32.mxu0 %vm4728_vm1, %v4727_v0 }
  0xb4   :  { %4438 = vmatpush3.msra.mxu0 %v1951_v61  ;;  %4349 = vmatpush3.msra.mxu1 %v1625_v62 }
  0xb5   :  { %4439 = vmatprep.subr.mxu0 %v4727_v0  ;;  %4350 = vmatprep.subr.mxu1 %v4727_v0 }
  0xb6   :  { %4189 = vmatmul.mubr.msk.f32.gmra.mxu1 %vm88_vm0, %v5141_v10  ;;  %4277 = vmatmul.mubr.msk.f32.gmra.mxu0 %vm88_vm0, %v3342_v63  ;;  %v1947_v10 = vld [vmem:[%s6858_s1 + $0x188] sm:$0xff] }
  0xb7   :  { %4191 = vmatprep.mubr.msk.f32.mxu1 %vm4728_vm1, %v4727_v0  ;;  %4279 = vmatprep.mubr.msk.f32.mxu0 %vm4728_vm1, %v4727_v0 }
  0xb8   :  { %4440 = vmatpush3.msra.mxu0 %v1950_v1  ;;  %4351 = vmatpush3.msra.mxu1 %v1624_v2 }
  0xb9   :  { %4441 = vmatprep.subr.mxu0 %v4727_v0  ;;  %4352 = vmatprep.subr.mxu1 %v4727_v0 }
  0xba   :  { %4192 = vmatmul.mubr.msk.f32.gmra.mxu1 %vm88_vm0, %v5164_v14  ;;  %4280 = vmatmul.mubr.msk.f32.gmra.mxu0 %vm88_vm0, %v3343_v3  ;;  %v3347_v14 = vld [vmem:[%s6859_s0 + $0x50] sm:$0xff] }
  0xbb   :  { %4194 = vmatprep.mubr.msk.f32.mxu1 %vm4728_vm1, %v4727_v0  ;;  %4282 = vmatprep.mubr.msk.f32.mxu0 %vm4728_vm1, %v4727_v0 }
  0xbc   :  { %4442 = vmatpush3.msra.mxu0 %v1949_v4  ;;  %4353 = vmatpush3.msra.mxu1 %v1623_v5 }
  0xbd   :  { %4443 = vmatprep.subr.mxu0 %v4727_v0  ;;  %4354 = vmatprep.subr.mxu1 %v4727_v0 }
  0xbe   :  { %4195 = vmatmul.mubr.msk.f32.gmra.mxu1 %vm88_vm0, %v5187_v18  ;;  %4283 = vmatmul.mubr.msk.f32.gmra.mxu0 %vm88_vm0, %v3344_v6 }
  0xbf   :  { %4197 = vmatprep.mubr.msk.f32.mxu1 %vm4728_vm1, %v4727_v0  ;;  %4285 = vmatprep.mubr.msk.f32.mxu0 %vm4728_vm1, %v4727_v0 }
  0xc0   :  { %4444 = vmatpush3.msra.mxu0 %v1948_v7  ;;  %4355 = vmatpush3.msra.mxu1 %v1622_v8 }
  0xc1   :  { %4445 = vmatprep.subr.mxu0 %v4727_v0  ;;  %4356 = vmatprep.subr.mxu1 %v4727_v0 }
  0xc2   :  { %4198 = vmatmul.mubr.msk.f32.gmra.mxu1 %vm88_vm0, %v5207_v21  ;;  %4286 = vmatmul.mubr.msk.f32.gmra.mxu0 %vm88_vm0, %v3345_v9 }
  0xc3   :  { %4200 = vmatprep.mubr.msk.f32.mxu1 %vm4728_vm1, %v4727_v0  ;;  %4288 = vmatprep.mubr.msk.f32.mxu0 %vm4728_vm1, %v4727_v0 }
  0xc4   :  { %4446 = vmatpush3.msra.mxu0 %v1947_v10  ;;  %4357 = vmatpush3.msra.mxu1 %v1621_v11 }
  0xc5   :  { %4447 = vmatprep.subr.mxu0 %v4727_v0  ;;  %4524 = vmatprep.subr.mxu1 %v4727_v0 }
  0xc6   :  { %4201 = vmatmul.mubr.msk.f32.gmra.mxu1 %vm88_vm0, %v5223_v23  ;;  %4289 = vmatmul.mubr.msk.f32.gmra.mxu0 %vm88_vm0, %v3346_v12 }
  0xc7   :  { %4203 = vmatprep.mubr.msk.f32.mxu1 %vm4728_vm1, %v4727_v0  ;;  %4291 = vmatprep.mubr.msk.f32.mxu0 %vm4728_vm1, %v4727_v0 }
  0xc8   :  { %4448 = vmatpush3.msra.mxu0 %v1946_v13 }
  0xc9   :  { %4615 = vmatprep.subr.mxu0 %v4727_v0 }
  0xca   :  { %4204 = vmatmul.mubr.msk.f32.gmra.mxu1 %vm88_vm0, %v5238_v25  ;;  %4292 = vmatmul.mubr.msk.f32.gmra.mxu0 %vm88_vm0, %v3347_v14 }
  0xcb   :  { %4206 = vmatprep.mubr.msk.f32.mxu1 %vm4728_vm1, %v4727_v0  ;;  %4294 = vmatprep.mubr.msk.f32.mxu0 %vm4728_vm1, %v4727_v0 }
  0xce   :  { %4207 = vmatmul.mubr.msk.f32.gmra.mxu1 %vm88_vm0, %v5253_v27  ;;  %4295 = vmatmul.mubr.msk.f32.gmra.mxu0 %vm88_vm0, %v3348_v15 }
  0xcf   :  { %4209 = vmatprep.mubr.msk.f32.mxu1 %vm4728_vm1, %v4727_v0  ;;  %4297 = vmatprep.mubr.msk.f32.mxu0 %vm4728_vm1, %v4727_v0 }
  0xd2   :  { %v5622_v17 = vpop.f32.mrf.mxu0  ;;  %v5624_v18 = vpop.f32.mrf.mxu1  ;;  %4210 = vmatmul.mubr.msk.f32.gmra.mxu1 %vm88_vm0, %v5268_v29  ;;  %4298 = vmatmul.mubr.msk.f32.gmra.mxu0 %vm88_vm0, %v3349_v16  ;;  %v3352_v29 = vld [vmem:[%s6859_s0 + $0x78] sm:$0xff] }
  0xd3   :  { %4212 = vmatprep.mubr.msk.f32.mxu1 %vm4728_vm1, %v4727_v0  ;;  %4300 = vmatprep.mubr.msk.f32.mxu0 %vm4728_vm1, %v4727_v0 }
  0xd4   :  { %v3905_v20 = vpop.f32.mrf.mxu0  ;;  %v3944_v21 = vpop.f32.mrf.mxu1 }
  0xd5   :  { %v3313_v20 = vld [vmem:[%s6859_s0 + $0xcf] sm:$0xff] }
  0xd6   :  { %v5636_v22 = vpop.f32.mrf.mxu0  ;;  %v5638_v23 = vpop.f32.mrf.mxu1  ;;  %4213 = vmatmul.mubr.msk.f32.gmra.mxu1 %vm88_vm0, %v5283_v31  ;;  %4301 = vmatmul.mubr.msk.f32.gmra.mxu0 %vm88_vm0, %v3350_v19  ;;  %v3362_v21 = vld [vmem:[%s6859_s0 + $0xc8] sm:$0xff] }
  0xd7   :  { %4215 = vmatprep.mubr.msk.f32.mxu1 %vm4728_vm1, %v4727_v0  ;;  %4303 = vmatprep.mubr.msk.f32.mxu0 %vm4728_vm1, %v4727_v0 }
  0xd8   :  { %v3908_v25 = vpop.f32.mrf.mxu0  ;;  %v3947_v26 = vpop.f32.mrf.mxu1 }
  0xda   :  { %v5650_v27 = vpop.f32.mrf.mxu0  ;;  %v5652_v28 = vpop.f32.mrf.mxu1  ;;  %4216 = vmatmul.mubr.msk.f32.gmra.mxu1 %vm88_vm0, %v5298_v33  ;;  %4304 = vmatmul.mubr.msk.f32.gmra.mxu0 %vm88_vm0, %v3351_v24  ;;  %v3353_v33 = vld [vmem:[%s6859_s0 + $0x80] sm:$0xff] }
  0xdb   :  { %4218 = vmatprep.mubr.msk.f32.mxu1 %vm4728_vm1, %v4727_v0  ;;  %4306 = vmatprep.mubr.msk.f32.mxu0 %vm4728_vm1, %v4727_v0 }
  0xdc   :  { %v3911_v30 = vpop.f32.mrf.mxu0  ;;  %v3950_v31 = vpop.f32.mrf.mxu1 }
  0xdd   :  { %v3363_v30 = vld [vmem:[%s6859_s0 + $0xd0] sm:$0xff] }
  0xde   :  { %v5664_v32 = vpop.f32.mrf.mxu0  ;;  %v5666_v34 = vpop.f32.mrf.mxu1  ;;  %4219 = vmatmul.mubr.msk.f32.gmra.mxu1 %vm88_vm0, %v5313_v35  ;;  %4307 = vmatmul.mubr.msk.f32.gmra.mxu0 %vm88_vm0, %v3352_v29  ;;  %v3354_v35 = vld [vmem:[%s6859_s0 + $0x88] sm:$0xff]  ;;  %v3389_v31 = vld [vmem:[%s6859_s0 + $0x11] sm:$0xff] }
  0xdf   :  { %4221 = vmatprep.mubr.msk.f32.mxu1 %vm4728_vm1, %v4727_v0  ;;  %4309 = vmatprep.mubr.msk.f32.mxu0 %vm4728_vm1, %v4727_v0 }
  0xe0   :  { %v3914_v36 = vpop.f32.mrf.mxu0  ;;  %v3953_v38 = vpop.f32.mrf.mxu1 }
  0xe2   :  { %v5678_v40 = vpop.f32.mrf.mxu0  ;;  %v5680_v42 = vpop.f32.mrf.mxu1  ;;  %4222 = vmatmul.mubr.msk.f32.gmra.mxu1 %vm88_vm0, %v5328_v37  ;;  %4310 = vmatmul.mubr.msk.f32.gmra.mxu0 %vm88_vm0, %v3353_v33  ;;  %v3355_v37 = vld [vmem:[%s6859_s0 + $0x90] sm:$0xff] }
  0xe3   :  { %4224 = vmatprep.mubr.msk.f32.mxu1 %vm4728_vm1, %v4727_v0  ;;  %4312 = vmatprep.mubr.msk.f32.mxu0 %vm4728_vm1, %v4727_v0 }
  0xe4   :  { %v3917_v44 = vpop.f32.mrf.mxu0  ;;  %v3956_v46 = vpop.f32.mrf.mxu1 }
  0xe6   :  { %v5692_v48 = vpop.f32.mrf.mxu0  ;;  %v5694_v50 = vpop.f32.mrf.mxu1  ;;  %4225 = vmatmul.mubr.msk.f32.gmra.mxu1 %vm88_vm0, %v5343_v39  ;;  %4313 = vmatmul.mubr.msk.f32.gmra.mxu0 %vm88_vm0, %v3354_v35  ;;  %v3356_v39 = vld [vmem:[%s6859_s0 + $0x98] sm:$0xff] }
  0xe7   :  { %4227 = vmatprep.mubr.msk.f32.mxu1 %vm4728_vm1, %v4727_v0  ;;  %4315 = vmatprep.mubr.msk.f32.mxu0 %vm4728_vm1, %v4727_v0 }
  0xe8   :  { %v3920_v53 = vpop.f32.mrf.mxu0  ;;  %v3959_v54 = vpop.f32.mrf.mxu1 }
  0xea   :  { %v5706_v55 = vpop.f32.mrf.mxu0  ;;  %v5708_v56 = vpop.f32.mrf.mxu1  ;;  %4228 = vmatmul.mubr.msk.f32.gmra.mxu1 %vm88_vm0, %v5358_v41  ;;  %4316 = vmatmul.mubr.msk.f32.gmra.mxu0 %vm88_vm0, %v3355_v37  ;;  %v3357_v41 = vld [vmem:[%s6859_s0 + $0xa0] sm:$0xff] }
  0xeb   :  { %4230 = vmatprep.mubr.msk.f32.mxu1 %vm4728_vm1, %v4727_v0  ;;  %4318 = vmatprep.mubr.msk.f32.mxu0 %vm4728_vm1, %v4727_v0  ;;  %v3390_v37 = vld [vmem:[%s6859_s0 + $0x19] sm:$0xff] }
  0xec   :  { %v3923_v57 = vpop.f32.mrf.mxu0  ;;  %v3962_v58 = vpop.f32.mrf.mxu1 }
  0xee   :  { %v5720_v59 = vpop.f32.mrf.mxu0  ;;  %v5722_v60 = vpop.f32.mrf.mxu1  ;;  %4231 = vmatmul.mubr.msk.f32.gmra.mxu1 %vm88_vm0, %v5373_v43  ;;  %4319 = vmatmul.mubr.msk.f32.gmra.mxu0 %vm88_vm0, %v3356_v39  ;;  %v3358_v43 = vld [vmem:[%s6859_s0 + $0xa8] sm:$0xff]  ;;  %v2603_v39 = vld [vmem:[%s6858_s1 + $0x238] sm:$0xff] }
  0xef   :  { %4233 = vmatprep.mubr.msk.f32.mxu1 %vm4728_vm1, %v4727_v0  ;;  %4321 = vmatprep.mubr.msk.f32.mxu0 %vm4728_vm1, %v4727_v0 }
  0xf0   :  { %v3926_v61 = vpop.f32.mrf.mxu0  ;;  %v3965_v62 = vpop.f32.mrf.mxu1 }
  0xf1   :  { %v3391_v62 = vld [vmem:[%s6859_s0 + $0x21] sm:$0xff] }
  0xf2   :  { %v5734_v63 = vpop.f32.mrf.mxu0  ;;  %v5736_v1 = vpop.f32.mrf.mxu1  ;;  %4234 = vmatmul.mubr.msk.f32.gmra.mxu1 %vm88_vm0, %v5388_v45  ;;  %4322 = vmatmul.mubr.msk.f32.gmra.mxu0 %vm88_vm0, %v3357_v41  ;;  %v3359_v45 = vld [vmem:[%s6859_s0 + $0xb0] sm:$0xff] }
  0xf3   :  { %4236 = vmatprep.mubr.msk.f32.mxu1 %vm4728_vm1, %v4727_v0  ;;  %4324 = vmatprep.mubr.msk.f32.mxu0 %vm4728_vm1, %v4727_v0 }
  0xf4   :  { %v3929_v2 = vpop.f32.mrf.mxu0  ;;  %v3968_v3 = vpop.f32.mrf.mxu1 }
  0xf5   :  { %v2276_v3 = vld [vmem:[%s6858_s1 + $0x1e8] sm:$0xff] }
  0xf6   :  { %v5748_v4 = vpop.f32.mrf.mxu0  ;;  %v5750_v5 = vpop.f32.mrf.mxu1  ;;  %4237 = vmatmul.mubr.msk.f32.gmra.mxu1 %vm88_vm0, %v5403_v47  ;;  %4325 = vmatmul.mubr.msk.f32.gmra.mxu0 %vm88_vm0, %v3358_v43  ;;  %v3360_v47 = vld [vmem:[%s6859_s0 + $0xb8] sm:$0xff] }
  0xf7   :  { %4239 = vmatprep.mubr.msk.f32.mxu1 %vm4728_vm1, %v4727_v0  ;;  %4327 = vmatprep.mubr.msk.f32.mxu0 %vm4728_vm1, %v4727_v0 }
  0xf8   :  { %v3932_v6 = vpop.f32.mrf.mxu0  ;;  %v3971_v7 = vpop.f32.mrf.mxu1 }
  0xfa   :  { %v5762_v8 = vpop.f32.mrf.mxu0  ;;  %v5764_v9 = vpop.f32.mrf.mxu1  ;;  %4240 = vmatmul.mubr.msk.f32.gmra.mxu1 %vm88_vm0, %v5418_v49  ;;  %4328 = vmatmul.mubr.msk.f32.gmra.mxu0 %vm88_vm0, %v3359_v45  ;;  %v3361_v49 = vld [vmem:[%s6859_s0 + $0xc0] sm:$0xff] }
  0xfb   :  { %4242 = vmatprep.mubr.msk.f32.mxu1 %vm4728_vm1, %v4727_v0  ;;  %4330 = vmatprep.mubr.msk.f32.mxu0 %vm4728_vm1, %v4727_v0 }
  0xfc   :  { %v3935_v10 = vpop.f32.mrf.mxu0  ;;  %v3974_v11 = vpop.f32.mrf.mxu1 }
  0xfd   :  { %v3392_v10 = vld [vmem:[%s6859_s0 + $0x29] sm:$0xff] }
  0xfe   :  { %v5776_v12 = vpop.f32.mrf.mxu0  ;;  %v5778_v13 = vpop.f32.mrf.mxu1  ;;  %4243 = vmatmul.mubr.msk.f32.gmra.mxu1 %vm88_vm0, %v5433_v51  ;;  %4331 = vmatmul.mubr.msk.f32.gmra.mxu0 %vm88_vm0, %v3360_v47 }
  0xff   :  { %4245 = vmatprep.mubr.msk.f32.mxu1 %vm4728_vm1, %v4727_v0  ;;  %4333 = vmatprep.mubr.msk.f32.mxu0 %vm4728_vm1, %v4727_v0 }
 0x100   :  { %v3938_v14 = vpop.f32.mrf.mxu0  ;;  %v3977_v15 = vpop.f32.mrf.mxu1 }
 0x101   :  { %v2275_v14 = vld [vmem:[%s6858_s1 + $0x1e0] sm:$0xff] }
 0x102   :  { %v5790_v16 = vpop.f32.mrf.mxu0  ;;  %v495_v19 = vpop.f32.mrf.mxu1  ;;  %4246 = vmatmul.mubr.msk.f32.gmra.mxu1 %vm88_vm0, %v5445_v52  ;;  %4334 = vmatmul.mubr.msk.f32.gmra.mxu0 %vm88_vm0, %v3361_v49 }
 0x103   :  { %v496_v51 = vadd.f32 %v495_v19, %v5622_v17  ;;  %4248 = vmatprep.mubr.msk.f32.mxu1 %vm4728_vm1, %v4727_v0  ;;  %4336 = vmatprep.mubr.msk.f32.mxu0 %vm4728_vm1, %v4727_v0 }
 0x104   :  { %v3941_v24 = vpop.f32.mrf.mxu0  ;;  %v3996_v52 = vpop.f32.mrf.mxu1 }
 0x106   :  { %v500_v25 = vpop.f32.mrf.mxu1  ;;  %v795_v26 = vpop.f32.mrf.mxu0  ;;  %4249 = vmatmul.mubr.msk.f32.gmra.mxu1 %vm88_vm0, %v3313_v20  ;;  %4337 = vmatmul.mubr.msk.f32.gmra.mxu0 %vm88_vm0, %v3362_v21  ;;  %v3393_v21 = vld [vmem:[%s6859_s0 + $0x31] sm:$0xff] }
 0x107   :  { %v501_v17 = vadd.f32 %v500_v25, %v5636_v22  ;;  %v5809_v29 = vadd.f32 %v795_v26, %v496_v51  ;;  %4339 = vmatprep.mubr.msk.f32.mxu0 %vm4728_vm1, %v4727_v0  ;;  %4358 = vmatprep.mubr.msk.f32.mxu1 %vm4728_vm1, %v4727_v0  ;;  %v2278_v22 = vld [vmem:[%s6858_s1 + $0x1f8] sm:$0xff] }
 0x108   :  { %v3999_v33 = vpop.f32.mrf.mxu1  ;;  %v4087_v36 = vpop.f32.mrf.mxu0  ;;  %v2274_v25 = vld [vmem:[%s6858_s1 + $0x1d8] sm:$0xff] }
 0x109   :  { %v3394_v33 = vld [vmem:[%s6859_s0 + $0x39] sm:$0xff] }
 0x10a   :  { %v505_v38 = vpop.f32.mrf.mxu1  ;;  %v800_v35 = vpop.f32.mrf.mxu0  ;;  %4340 = vmatmul.mubr.msk.f32.gmra.mxu0 %vm88_vm0, %v3363_v30  ;;  %4359 = vmatmul.mubr.msk.f32.vlgmr.msra.gmra.mxu1 %vm88_vm0, %v3389_v31 }
 0x10b   :  { %v506_v44 = vadd.f32 %v505_v38, %v5650_v27  ;;  %v5827_v46 = vadd.f32 %v800_v35, %v501_v17  ;;  %4361 = vmatprep.mubr.msk.f32.mxu1 %vm4728_vm1, %v4727_v0  ;;  %4449 = vmatprep.mubr.msk.f32.mxu0 %vm4728_vm1, %v4727_v0  ;;  %v2277_v27 = vld [vmem:[%s6858_s1 + $0x1f0] sm:$0xff] }
 0x10c   :  { %v4002_v53 = vpop.f32.mrf.mxu1  ;;  %v4090_v54 = vpop.f32.mrf.mxu0  ;;  %4525 = vmatpush3.msra.mxu1 %v2278_v22  ;;  %v2273_v38 = vld [vmem:[%s6858_s1 + $0x1d0] sm:$0xff] }
 0x10d   :  { %4526 = vmatprep.subr.mxu1 %v4727_v0  ;;  %v3395_v54 = vld [vmem:[%s6859_s0 + $0x41] sm:$0xff] }
 0x10e   :  { %v510_v57 = vpop.f32.mrf.mxu1  ;;  %v805_v58 = vpop.f32.mrf.mxu0  ;;  %4362 = vmatmul.mubr.msk.f32.gmra.mxu1 %vm88_vm0, %v3390_v37  ;;  %4450 = vmatmul.mubr.msk.f32.vlgmr.msra.gmra.mxu0 %vm88_vm0, %v3390_v37 }
 0x10f   :  { %v511_v41 = vadd.f32 %v510_v57, %v5664_v32  ;;  %v5846_v61 = vadd.f32 %v805_v58, %v506_v44  ;;  %4616 = vmatpush3.msra.mxu0 %v2603_v39  ;;  %4364 = vmatprep.mubr.msk.f32.mxu1 %vm4728_vm1, %v4727_v0  ;;  %v2602_v32 = vld [vmem:[%s6858_s1 + $0x230] sm:$0xff]  ;;  %v2272_v57 = vld [vmem:[%s6858_s1 + $0x1c8] sm:$0xff] }
 0x110   :  { %v4005_v43 = vpop.f32.mrf.mxu1  ;;  %v4093_v2 = vpop.f32.mrf.mxu0  ;;  %4452 = vmatprep.mubr.msk.f32.mxu0 %vm4728_vm1, %v4727_v0  ;;  %4527 = vmatpush3.msra.mxu1 %v2277_v27 }
 0x111   :  { %4617 = vmatprep.subr.mxu0 %v4727_v0  ;;  %4528 = vmatprep.subr.mxu1 %v4727_v0  ;;  %v3396_v2 = vld [vmem:[%s6859_s0 + $0x49] sm:$0xff] }
 0x112   :  { %v515_v45 = vpop.f32.mrf.mxu1  ;;  %v810_v6 = vpop.f32.mrf.mxu0  ;;  %4365 = vmatmul.mubr.msk.f32.gmra.mxu1 %vm88_vm0, %v3391_v62  ;;  %4453 = vmatmul.mubr.msk.f32.gmra.mxu0 %vm88_vm0, %v3391_v62 }
 0x113   :  { %v516_v7 = vadd.f32 %v515_v45, %v5678_v40  ;;  %v5866_v47 = vadd.f32 %v810_v6, %v511_v41  ;;  %4367 = vmatprep.mubr.msk.f32.mxu1 %vm4728_vm1, %v4727_v0  ;;  %4455 = vmatprep.mubr.msk.f32.mxu0 %vm4728_vm1, %v4727_v0  ;;  %v2601_v40 = vld [vmem:[%s6858_s1 + $0x228] sm:$0xff]  ;;  %v2271_v45 = vld [vmem:[%s6858_s1 + $0x1c0] sm:$0xff] }
 0x114   :  { %v4008_v11 = vpop.f32.mrf.mxu1  ;;  %v4096_v49 = vpop.f32.mrf.mxu0  ;;  %4618 = vmatpush3.msra.mxu0 %v2602_v32  ;;  %4529 = vmatpush3.msra.mxu1 %v2276_v3 }
 0x115   :  { %4619 = vmatprep.subr.mxu0 %v4727_v0  ;;  %4530 = vmatprep.subr.mxu1 %v4727_v0  ;;  %v3397_v49 = vld [vmem:[%s6859_s0 + $0x51] sm:$0xff] }
 0x116   :  { %v520_v15 = vpop.f32.mrf.mxu1  ;;  %v815_v19 = vpop.f32.mrf.mxu0  ;;  %4368 = vmatmul.mubr.msk.f32.gmra.mxu1 %vm88_vm0, %v3392_v10  ;;  %4456 = vmatmul.mubr.msk.f32.gmra.mxu0 %vm88_vm0, %v3392_v10 }
 0x117   :  { %v521_v51 = vadd.f32 %v520_v15, %v5692_v48  ;;  %v5886_v20 = vadd.f32 %v815_v19, %v516_v7  ;;  %4370 = vmatprep.mubr.msk.f32.mxu1 %vm4728_vm1, %v4727_v0  ;;  %4458 = vmatprep.mubr.msk.f32.mxu0 %vm4728_vm1, %v4727_v0  ;;  %v2600_v48 = vld [vmem:[%s6858_s1 + $0x220] sm:$0xff] }
 0x118   :  { %v4011_v24 = vpop.f32.mrf.mxu1  ;;  %v4099_v52 = vpop.f32.mrf.mxu0  ;;  %4620 = vmatpush3.msra.mxu0 %v2601_v40  ;;  %4531 = vmatpush3.msra.mxu1 %v2275_v14 }
 0x119   :  { %4621 = vmatprep.subr.mxu0 %v4727_v0  ;;  %4532 = vmatprep.subr.mxu1 %v4727_v0  ;;  %v3398_v24 = vld [vmem:[%s6859_s0 + $0x59] sm:$0xff] }
 0x11a   :  { %v525_v26 = vpop.f32.mrf.mxu1  ;;  %v820_v17 = vpop.f32.mrf.mxu0  ;;  %4371 = vmatmul.mubr.msk.f32.gmra.mxu1 %vm88_vm0, %v3393_v21  ;;  %4459 = vmatmul.mubr.msk.f32.gmra.mxu0 %vm88_vm0, %v3393_v21 }
 0x11b   :  { %v526_v30 = vadd.f32 %v525_v26, %v5706_v55  ;;  %v5906_v31 = vadd.f32 %v820_v17, %v521_v51  ;;  %4373 = vmatprep.mubr.msk.f32.mxu1 %vm4728_vm1, %v4727_v0  ;;  %4461 = vmatprep.mubr.msk.f32.mxu0 %vm4728_vm1, %v4727_v0  ;;  %v2599_v55 = vld [vmem:[%s6858_s1 + $0x218] sm:$0xff] }
 0x11c   :  { %v4014_v36 = vpop.f32.mrf.mxu1  ;;  %v4102_v22 = vpop.f32.mrf.mxu0  ;;  %4622 = vmatpush3.msra.mxu0 %v2600_v48  ;;  %4533 = vmatpush3.msra.mxu1 %v2274_v25 }
 0x11d   :  { %4623 = vmatprep.subr.mxu0 %v4727_v0  ;;  %4534 = vmatprep.subr.mxu1 %v4727_v0 }
 0x11e   :  { %v530_v35 = vpop.f32.mrf.mxu1  ;;  %v825_v44 = vpop.f32.mrf.mxu0  ;;  %4374 = vmatmul.mubr.msk.f32.gmra.mxu1 %vm88_vm0, %v3394_v33  ;;  %4462 = vmatmul.mubr.msk.f32.gmra.mxu0 %vm88_vm0, %v3394_v33 }
 0x11f   :  { %v531_v37 = vadd.f32 %v530_v35, %v5720_v59  ;;  %v5926_v53 = vadd.f32 %v825_v44, %v526_v30  ;;  %4376 = vmatprep.mubr.msk.f32.mxu1 %vm4728_vm1, %v4727_v0  ;;  %4464 = vmatprep.mubr.msk.f32.mxu0 %vm4728_vm1, %v4727_v0  ;;  %v2598_v59 = vld [vmem:[%s6858_s1 + $0x210] sm:$0xff]  ;;  %v3399_v30 = vld [vmem:[%s6859_s0 + $0x61] sm:$0xff] }
 0x120   :  { %v4017_v39 = vpop.f32.mrf.mxu1  ;;  %v4105_v27 = vpop.f32.mrf.mxu0  ;;  %4624 = vmatpush3.msra.mxu0 %v2599_v55  ;;  %4535 = vmatpush3.msra.mxu1 %v2273_v38  ;;  %v3400_v35 = vld [vmem:[%s6859_s0 + $0x69] sm:$0xff] }
 0x121   :  { %4625 = vmatprep.subr.mxu0 %v4727_v0  ;;  %4536 = vmatprep.subr.mxu1 %v4727_v0  ;;  %v3401_v27 = vld [vmem:[%s6859_s0 + $0x71] sm:$0xff] }
 0x122   :  { %v535_v58 = vpop.f32.mrf.mxu1  ;;  %v830_v41 = vpop.f32.mrf.mxu0  ;;  %4377 = vmatmul.mubr.msk.f32.gmra.mxu1 %vm88_vm0, %v3395_v54  ;;  %4465 = vmatmul.mubr.msk.f32.gmra.mxu0 %vm88_vm0, %v3395_v54 }
 0x123   :  { %v536_v62 = vadd.f32 %v535_v58, %v5734_v63  ;;  %v5946_v43 = vadd.f32 %v830_v41, %v531_v37  ;;  %4379 = vmatprep.mubr.msk.f32.mxu1 %vm4728_vm1, %v4727_v0  ;;  %4467 = vmatprep.mubr.msk.f32.mxu0 %vm4728_vm1, %v4727_v0  ;;  %v2597_v63 = vld [vmem:[%s6858_s1 + $0x208] sm:$0xff]  ;;  %v4729_v41 = vmov 0  }
 0x124   :  { %v4020_v32 = vpop.f32.mrf.mxu1  ;;  %v4108_v3 = vpop.f32.mrf.mxu0  ;;  %4626 = vmatpush3.msra.mxu0 %v2598_v59  ;;  %4537 = vmatpush3.msra.mxu1 %v2272_v57 }
 0x125   :  { %4627 = vmatprep.subr.mxu0 %v4727_v0  ;;  %4538 = vmatprep.subr.mxu1 %v4727_v0  ;;  %v2926_v32 = vld [vmem:[%s6860_s3] sm:$0xff] }
 0x126   :  { %v540_v6 = vpop.f32.mrf.mxu1  ;;  %v835_v7 = vpop.f32.mrf.mxu0  ;;  %4380 = vmatmul.mubr.msk.f32.gmra.mxu1 %vm88_vm0, %v3396_v2  ;;  %4468 = vmatmul.mubr.msk.f32.gmra.mxu0 %vm88_vm0, %v3396_v2 }
 0x127   :  { %v541_v10 = vadd.f32 %v540_v6, %v5748_v4  ;;  %v5966_v11 = vadd.f32 %v835_v7, %v536_v62  ;;  %4382 = vmatprep.mubr.msk.f32.mxu1 %vm4728_vm1, %v4727_v0  ;;  %4470 = vmatprep.mubr.msk.f32.mxu0 %vm4728_vm1, %v4727_v0  ;;  %v2596_v4 = vld [vmem:[%s6858_s1 + $0x200] sm:$0xff] }
 0x128   :  { %v4023_v40 = vpop.f32.mrf.mxu1  ;;  %v4111_v14 = vpop.f32.mrf.mxu0  ;;  %4628 = vmatpush3.msra.mxu0 %v2597_v63  ;;  %4539 = vmatpush3.msra.mxu1 %v2271_v45 }
 0x129   :  { %4629 = vmatprep.subr.mxu0 %v4727_v0  ;;  %4725 = vset.pattern.permute.xlu0 %v4729_v41 }
 0x12a   :  { %v545_v15 = vpop.f32.mrf.mxu1  ;;  %v840_v19 = vpop.f32.mrf.mxu0  ;;  %4383 = vmatmul.mubr.msk.f32.gmra.mxu1 %vm88_vm0, %v3397_v49  ;;  %4471 = vmatmul.mubr.msk.f32.gmra.mxu0 %vm88_vm0, %v3397_v49  ;;  %v2927_v49 = vld [vmem:[%s6860_s3 + $0x8] sm:$0xff] }
 0x12b   :  { %v546_v51 = vadd.f32 %v545_v15, %v5762_v8  ;;  %v5982_v21 = vadd.f32 %v840_v19, %v541_v10  ;;  %4385 = vmatprep.mubr.msk.f32.mxu1 %vm4728_vm1, %v4727_v0  ;;  %4473 = vmatprep.mubr.msk.f32.mxu0 %vm4728_vm1, %v4727_v0 }
 0x12c   :  { %v4026_v52 = vpop.f32.mrf.mxu1  ;;  %v4114_v48 = vpop.f32.mrf.mxu0  ;;  %4630 = vmatpush3.msra.mxu0 %v2596_v4  ;;  %4726 = vset.pattern.permute.xlu1 %v4729_v41 }
 0x12d   :  { %2953 = vperm.xlu0 %4725, %v2926_v32   ;;  %v2930_v52 = vld [vmem:[%s6860_s3 + $0x20] sm:$0xff]  ;;  %v2933_v32 = vld [vmem:[%s6860_s3 + $0x38] sm:$0xff] }
 0x12e   :  { %v550_v25 = vpop.f32.mrf.mxu1  ;;  %v845_v26 = vpop.f32.mrf.mxu0  ;;  %4386 = vmatmul.mubr.msk.f32.gmra.mxu1 %vm88_vm0, %v3398_v24  ;;  %4474 = vmatmul.mubr.msk.f32.gmra.mxu0 %vm88_vm0, %v3398_v24  ;;  %v2928_v24 = vld [vmem:[%s6860_s3 + $0x10] sm:$0xff] }
 0x12f   :  { %v551_v8 = vadd.f32 %v550_v25, %v5776_v12  ;;  %v5994_v17 = vadd.f32 %v845_v26, %v546_v51  ;;  %4388 = vmatprep.mubr.msk.f32.mxu1 %vm4728_vm1, %v4727_v0  ;;  %4476 = vmatprep.mubr.msk.f32.mxu0 %vm4728_vm1, %v4727_v0 }
 0x130   :  { %v4029_v33 = vpop.f32.mrf.mxu1  ;;  %v4117_v36 = vpop.f32.mrf.mxu0  ;;  %2963 = vperm.xlu1 %4726, %v2928_v24  }
 0x131   :  { %2958 = vperm.xlu0 %4725, %v2927_v49   ;;  %v2929_v36 = vld [vmem:[%s6860_s3 + $0x18] sm:$0xff] }
 0x132   :  { %v555_v22 = vpop.f32.mrf.mxu1  ;;  %v850_v55 = vpop.f32.mrf.mxu0  ;;  %4389 = vmatmul.mubr.msk.f32.gmra.mxu1 %vm88_vm0, %v3399_v30  ;;  %4477 = vmatmul.mubr.msk.f32.gmra.mxu0 %vm88_vm0, %v3399_v30 }
 0x133   :  { %v556_v12 = vadd.f32 %v555_v22, %v5790_v16  ;;  %v6006_v38 = vadd.f32 %v850_v55, %v551_v8  ;;  %4391 = vmatprep.mubr.msk.f32.mxu1 %vm4728_vm1, %v4727_v0  ;;  %4479 = vmatprep.mubr.msk.f32.mxu0 %vm4728_vm1, %v4727_v0  ;;  %v2932_v22 = vld [vmem:[%s6860_s3 + $0x30] sm:$0xff] }
 0x134   :  { %v4032_v44 = vpop.f32.mrf.mxu1  ;;  %v4120_v37 = vpop.f32.mrf.mxu0  ;;  %2968 = vperm.xlu1 %4726, %v2929_v36  }
 0x135   :  { %2973 = vperm.xlu0 %4725, %v2930_v52  }
 0x136   :  { %v560_v54 = vpop.f32.mrf.mxu1  ;;  %v855_v39 = vpop.f32.mrf.mxu0  ;;  %4392 = vmatmul.mubr.msk.f32.gmra.mxu1 %vm88_vm0, %v3400_v35  ;;  %4480 = vmatmul.mubr.msk.f32.gmra.mxu0 %vm88_vm0, %v3400_v35 }
 0x137   :  { %v6017_v16 = vadd.f32 %v855_v39, %v556_v12  ;;  %4394 = vmatprep.mubr.msk.f32.mxu1 %vm4728_vm1, %v4727_v0  ;;  %4482 = vmatprep.mubr.msk.f32.mxu0 %vm4728_vm1, %v4727_v0  ;;  %v561_v58 = vadd.f32 %v560_v54, %v5624_v18  ;;  %v3402_v18 = vld [vmem:[%s6859_s0 + $0x79] sm:$0xff]  ;;  %v2931_v39 = vld [vmem:[%s6860_s3 + $0x28] sm:$0xff] }
 0x138   :  { %v4035_v59 = vpop.f32.mrf.mxu1  ;;  %v4123_v57 = vpop.f32.mrf.mxu0  ;;  %2978 = vperm.xlu1 %4726, %v2931_v39  }
 0x139   :  { %2983 = vperm.xlu0 %4725, %v2932_v22  }
 0x13a   :  { %v565_v62 = vpop.f32.mrf.mxu1  ;;  %v860_v2 = vpop.f32.mrf.mxu0  ;;  %4395 = vmatmul.mubr.msk.f32.gmra.mxu1 %vm88_vm0, %v3401_v27  ;;  %4483 = vmatmul.mubr.msk.f32.gmra.mxu0 %vm88_vm0, %v3401_v27  ;;  %v2934_v27 = vld [vmem:[%s6860_s3 + $0x40] sm:$0xff] }
 0x13b   :  { %v6032_v3 = vadd.f32 %v860_v2, %v561_v58  ;;  %4397 = vmatprep.mubr.msk.f32.mxu1 %vm4728_vm1, %v4727_v0  ;;  %4485 = vmatprep.mubr.msk.f32.mxu0 %vm4728_vm1, %v4727_v0  ;;  %v566_v6 = vadd.f32 %v565_v62, %v5638_v23  ;;  %v3403_v23 = vld [vmem:[%s6859_s0 + $0x81] sm:$0xff] }
 0x13c   :  { %v4038_v63 = vpop.f32.mrf.mxu1  ;;  %v4126_v45 = vpop.f32.mrf.mxu0  ;;  %2988 = vperm.xlu1 %4726, %v2933_v32  }
 0x13d   :  { %2993 = vperm.xlu0 %4725, %v2934_v27  }
 0x13e   :  { %v570_v7 = vpop.f32.mrf.mxu1  ;;  %v865_v10 = vpop.f32.mrf.mxu0  ;;  %4398 = vmatmul.mubr.msk.f32.gmra.mxu1 %vm88_vm0, %v3402_v18  ;;  %4486 = vmatmul.mubr.msk.f32.gmra.mxu0 %vm88_vm0, %v3402_v18  ;;  %v2936_v18 = vld [vmem:[%s6860_s3 + $0x50] sm:$0xff] }
 0x13f   :  { %v6047_v40 = vadd.f32 %v865_v10, %v566_v6  ;;  %4400 = vmatprep.mubr.msk.f32.mxu1 %vm4728_vm1, %v4727_v0  ;;  %4488 = vmatprep.mubr.msk.f32.mxu0 %vm4728_vm1, %v4727_v0  ;;  %v571_v15 = vadd.f32 %v570_v7, %v5652_v28  ;;  %v3404_v28 = vld [vmem:[%s6859_s0 + $0x89] sm:$0xff] }
 0x140   :  { %v4041_v14 = vpop.f32.mrf.mxu1  ;;  %v4129_v4 = vpop.f32.mrf.mxu0 }
 0x141   :  { %3003 = vperm.xlu0 %4725, %v2936_v18   ;;  %v2938_v14 = vld [vmem:[%s6860_s3 + $0x60] sm:$0xff] }
 0x142   :  { %v575_v19 = vpop.f32.mrf.mxu1  ;;  %v870_v51 = vpop.f32.mrf.mxu0  ;;  %4401 = vmatmul.mubr.msk.f32.gmra.mxu1 %vm88_vm0, %v3403_v23  ;;  %4489 = vmatmul.mubr.msk.f32.gmra.mxu0 %vm88_vm0, %v3403_v23  ;;  %v2935_v23 = vld [vmem:[%s6860_s3 + $0x48] sm:$0xff] }
 0x143   :  { %v6065_v48 = vadd.f32 %v870_v51, %v571_v15  ;;  %4403 = vmatprep.mubr.msk.f32.mxu1 %vm4728_vm1, %v4727_v0  ;;  %4491 = vmatprep.mubr.msk.f32.mxu0 %vm4728_vm1, %v4727_v0  ;;  %v576_v8 = vadd.f32 %v575_v19, %v5666_v34  ;;  %v3405_v34 = vld [vmem:[%s6859_s0 + $0x91] sm:$0xff] }
 0x144   :  { %v4044_v25 = vpop.f32.mrf.mxu1  ;;  %v4132_v26 = vpop.f32.mrf.mxu0  ;;  %2998 = vperm.xlu1 %4726, %v2935_v23  }
 0x145   :  { %3013 = vperm.xlu0 %4725, %v2938_v14   ;;  %v2940_v25 = vld [vmem:[%s6860_s3 + $0x70] sm:$0xff] }
 0x146   :  { %v580_v30 = vpop.f32.mrf.mxu1  ;;  %v875_v33 = vpop.f32.mrf.mxu0  ;;  %4404 = vmatmul.mubr.msk.f32.gmra.mxu1 %vm88_vm0, %v3404_v28  ;;  %4492 = vmatmul.mubr.msk.f32.gmra.mxu0 %vm88_vm0, %v3404_v28  ;;  %v2937_v28 = vld [vmem:[%s6860_s3 + $0x58] sm:$0xff] }
 0x147   :  { %v6083_v55 = vadd.f32 %v875_v33, %v576_v8  ;;  %4406 = vmatprep.mubr.msk.f32.mxu1 %vm4728_vm1, %v4727_v0  ;;  %4494 = vmatprep.mubr.msk.f32.mxu0 %vm4728_vm1, %v4727_v0  ;;  %v581_v44 = vadd.f32 %v580_v30, %v5680_v42  ;;  %v3406_v42 = vld [vmem:[%s6859_s0 + $0x99] sm:$0xff] }
 0x148   :  { %v4047_v12 = vpop.f32.mrf.mxu1  ;;  %v4135_v35 = vpop.f32.mrf.mxu0  ;;  %3008 = vperm.xlu1 %4726, %v2937_v28  }
 0x149   :  { %3023 = vperm.xlu0 %4725, %v2940_v25   ;;  %v2942_v12 = vld [vmem:[%s6860_s3 + $0x80] sm:$0xff] }
 0x14a   :  { %v585_v37 = vpop.f32.mrf.mxu1  ;;  %v880_v54 = vpop.f32.mrf.mxu0  ;;  %4407 = vmatmul.mubr.msk.f32.gmra.mxu1 %vm88_vm0, %v3405_v34  ;;  %4495 = vmatmul.mubr.msk.f32.gmra.mxu0 %vm88_vm0, %v3405_v34  ;;  %v2939_v34 = vld [vmem:[%s6860_s3 + $0x68] sm:$0xff] }
 0x14b   :  { %v6101_v59 = vadd.f32 %v880_v54, %v581_v44  ;;  %4409 = vmatprep.mubr.msk.f32.mxu1 %vm4728_vm1, %v4727_v0  ;;  %4497 = vmatprep.mubr.msk.f32.mxu0 %vm4728_vm1, %v4727_v0  ;;  %v586_v41 = vadd.f32 %v585_v37, %v5694_v50  ;;  %v3407_v50 = vld [vmem:[%s6859_s0 + $0xa1] sm:$0xff] }
 0x14c   :  { %v4050_v57 = vpop.f32.mrf.mxu1  ;;  %v4138_v58 = vpop.f32.mrf.mxu0  ;;  %3018 = vperm.xlu1 %4726, %v2939_v34  }
 0x14d   :  { %3033 = vperm.xlu0 %4725, %v2942_v12   ;;  %v2944_v57 = vld [vmem:[%s6860_s3 + $0x90] sm:$0xff] }
 0x14e   :  { %v590_v62 = vpop.f32.mrf.mxu1  ;;  %v885_v2 = vpop.f32.mrf.mxu0  ;;  %4410 = vmatmul.mubr.msk.f32.gmra.mxu1 %vm88_vm0, %v3406_v42  ;;  %4498 = vmatmul.mubr.msk.f32.gmra.mxu0 %vm88_vm0, %v3406_v42  ;;  %v2941_v42 = vld [vmem:[%s6860_s3 + $0x78] sm:$0xff] }
 0x14f   :  { %v6119_v63 = vadd.f32 %v885_v2, %v586_v41  ;;  %4412 = vmatprep.mubr.msk.f32.mxu1 %vm4728_vm1, %v4727_v0  ;;  %4500 = vmatprep.mubr.msk.f32.mxu0 %vm4728_vm1, %v4727_v0  ;;  %v591_v7 = vadd.f32 %v590_v62, %v5708_v56  ;;  %v3408_v56 = vld [vmem:[%s6859_s0 + $0xa9] sm:$0xff] }
 0x150   :  { %v4053_v45 = vpop.f32.mrf.mxu1  ;;  %v4141_v6 = vpop.f32.mrf.mxu0  ;;  %3028 = vperm.xlu1 %4726, %v2941_v42  }
 0x151   :  { %3043 = vperm.xlu0 %4725, %v2944_v57   ;;  %v2946_v45 = vld [vmem:[%s6860_s3 + $0xa0] sm:$0xff] }
 0x152   :  { %v595_v10 = vpop.f32.mrf.mxu1  ;;  %v890_v49 = vpop.f32.mrf.mxu0  ;;  %4413 = vmatmul.mubr.msk.f32.gmra.mxu1 %vm88_vm0, %v3407_v50  ;;  %4501 = vmatmul.mubr.msk.f32.gmra.mxu0 %vm88_vm0, %v3407_v50  ;;  %v2943_v50 = vld [vmem:[%s6860_s3 + $0x88] sm:$0xff] }
 0x153   :  { %v6137_v4 = vadd.f32 %v890_v49, %v591_v7  ;;  %4415 = vmatprep.mubr.msk.f32.mxu1 %vm4728_vm1, %v4727_v0  ;;  %4503 = vmatprep.mubr.msk.f32.mxu0 %vm4728_vm1, %v4727_v0  ;;  %v596_v51 = vadd.f32 %v595_v10, %v5722_v60  ;;  %v3409_v60 = vld [vmem:[%s6859_s0 + $0xb1] sm:$0xff] }
 0x154   :  { %v4056_v15 = vpop.f32.mrf.mxu1  ;;  %v4144_v19 = vpop.f32.mrf.mxu0  ;;  %3038 = vperm.xlu1 %4726, %v2943_v50  }
 0x155   :  { %3053 = vperm.xlu0 %4725, %v2946_v45   ;;  %v2948_v15 = vld [vmem:[%s6860_s3 + $0xb0] sm:$0xff] }
 0x156   :  { %v600_v24 = vpop.f32.mrf.mxu1  ;;  %v895_v52 = vpop.f32.mrf.mxu0  ;;  %4416 = vmatmul.mubr.msk.f32.gmra.mxu1 %vm88_vm0, %v3408_v56  ;;  %4504 = vmatmul.mubr.msk.f32.gmra.mxu0 %vm88_vm0, %v3408_v56  ;;  %v2945_v56 = vld [vmem:[%s6860_s3 + $0x98] sm:$0xff] }
 0x157   :  { %v6155_v26 = vadd.f32 %v895_v52, %v596_v51  ;;  %4418 = vmatprep.mubr.msk.f32.mxu1 %vm4728_vm1, %v4727_v0  ;;  %4506 = vmatprep.mubr.msk.f32.mxu0 %vm4728_vm1, %v4727_v0  ;;  %v601_v33 = vadd.f32 %v600_v24, %v5736_v1  ;;  %v3410_v1 = vld [vmem:[%s6859_s0 + $0xb9] sm:$0xff] }
 0x158   :  { %v4059_v8 = vpop.f32.mrf.mxu1  ;;  %v4147_v30 = vpop.f32.mrf.mxu0  ;;  %3048 = vperm.xlu1 %4726, %v2945_v56  }
 0x159   :  { %3063 = vperm.xlu0 %4725, %v2948_v15  }
 0x15a   :  { %v605_v36 = vpop.f32.mrf.mxu1  ;;  %v900_v22 = vpop.f32.mrf.mxu0  ;;  %4419 = vmatmul.mubr.msk.f32.gmra.mxu1 %vm88_vm0, %v3409_v60  ;;  %4507 = vmatmul.mubr.msk.f32.gmra.mxu0 %vm88_vm0, %v3409_v60  ;;  %v2950_v60 = vld [vmem:[%s6860_s3 + $0xc0] sm:$0xff] }
 0x15b   :  { %v6173_v35 = vadd.f32 %v900_v22, %v601_v33  ;;  %4421 = vmatprep.mubr.msk.f32.mxu1 %vm4728_vm1, %v4727_v0  ;;  %4509 = vmatprep.mubr.msk.f32.mxu0 %vm4728_vm1, %v4727_v0  ;;  %v606_v54 = vadd.f32 %v605_v36, %v5750_v5  ;;  %v3411_v5 = vld [vmem:[%s6859_s0 + $0xc1] sm:$0xff]  ;;  %v3463_v33 = vld [vmem:[%s6859_s0 + $0xd9] sm:$0xff] }
 0x15c   :  { %v4062_v44 = vpop.f32.mrf.mxu1  ;;  %v4150_v37 = vpop.f32.mrf.mxu0  ;;  %v3489_v36 = vld [vmem:[%s6859_s0 + $0x1a] sm:$0xff] }
 0x15d   :  { %3073 = vperm.xlu0 %4725, %v2950_v60   ;;  %v3494_v60 = vld [vmem:[%s6859_s0 + $0x42] sm:$0xff] }
 0x15e   :  { %v610_v39 = vpop.f32.mrf.mxu1  ;;  %v905_v27 = vpop.f32.mrf.mxu0  ;;  %4422 = vmatmul.mubr.msk.f32.gmra.mxu1 %vm88_vm0, %v3410_v1  ;;  %4510 = vmatmul.mubr.msk.f32.gmra.mxu0 %vm88_vm0, %v3410_v1  ;;  %v2949_v1 = vld [vmem:[%s6860_s3 + $0xb8] sm:$0xff] }
 0x15f   :  { %v6191_v58 = vadd.f32 %v905_v27, %v606_v54  ;;  %4424 = vmatprep.mubr.msk.f32.mxu1 %vm4728_vm1, %v4727_v0  ;;  %4512 = vmatprep.mubr.msk.f32.mxu0 %vm4728_vm1, %v4727_v0  ;;  %v611_v2 = vadd.f32 %v610_v39, %v5764_v9  ;;  %v3412_v9 = vld [vmem:[%s6859_s0 + $0xc9] sm:$0xff]  ;;  %v3539_v39 = vld [vmem:[%s6859_s0 + $0x1b] sm:$0xff] }
 0x160   :  { %v4065_v41 = vpop.f32.mrf.mxu1  ;;  %v4153_v62 = vpop.f32.mrf.mxu0  ;;  %v3490_v54 = vld [vmem:[%s6859_s0 + $0x22] sm:$0xff] }
 0x161   :  { %v3491_v62 = vld [vmem:[%s6859_s0 + $0x2a] sm:$0xff] }
 0x162   :  { %v615_v32 = vpop.f32.mrf.mxu1  ;;  %v910_v18 = vpop.f32.mrf.mxu0  ;;  %4425 = vmatmul.mubr.msk.f32.gmra.mxu1 %vm88_vm0, %v3411_v5  ;;  %4513 = vmatmul.mubr.msk.f32.gmra.mxu0 %vm88_vm0, %v3411_v5 }
 0x163   :  { %v6209_v6 = vadd.f32 %v910_v18, %v611_v2  ;;  %4427 = vmatprep.mubr.msk.f32.mxu1 %vm4728_vm1, %v4727_v0  ;;  %4515 = vmatprep.mubr.msk.f32.mxu0 %vm4728_vm1, %v4727_v0  ;;  %v616_v49 = vadd.f32 %v615_v32, %v5778_v13  ;;  %v3413_v13 = vld [vmem:[%s6859_s0 + $0xd1] sm:$0xff]  ;;  %v3540_v2 = vld [vmem:[%s6859_s0 + $0x23] sm:$0xff] }
 0x164   :  { %v4068_v7 = vpop.f32.mrf.mxu1  ;;  %v4156_v10 = vpop.f32.mrf.mxu0 }
 0x165   :  { %v3492_v7 = vld [vmem:[%s6859_s0 + $0x32] sm:$0xff] }
 0x166   :  { %v915_v23 = vpop.f32.mrf.mxu0  ;;  %v1120_v14 = vpop.f32.mrf.mxu1  ;;  %4428 = vmatmul.mubr.msk.f32.gmra.mxu1 %vm88_vm0, %v3412_v9  ;;  %4516 = vmatmul.mubr.msk.f32.gmra.mxu0 %vm88_vm0, %v3412_v9  ;;  %v3541_v10 = vld [vmem:[%s6859_s0 + $0x2b] sm:$0xff] }
 0x167   :  { %v6227_v19 = vadd.f32 %v915_v23, %v616_v49  ;;  %v1244_v51 = vadd.f32 %v1120_v14, %v5809_v29  ;;  %4430 = vmatprep.mubr.msk.f32.mxu1 %vm4728_vm1, %v4727_v0  ;;  %4518 = vmatprep.mubr.msk.f32.mxu0 %vm4728_vm1, %v4727_v0  ;;  %v2947_v29 = vld [vmem:[%s6860_s3 + $0xa8] sm:$0xff] }
 0x168   :  { %v4159_v24 = vpop.f32.mrf.mxu0  ;;  %v4178_v52 = vpop.f32.mrf.mxu1  ;;  %3058 = vperm.xlu1 %4726, %v2947_v29  }
 0x16a   :  { %v1125_v28 = vpop.f32.mrf.mxu1  ;;  %v1445_v25 = vpop.f32.mrf.mxu0  ;;  %4431 = vmatmul.mubr.msk.f32.gmra.mxu1 %vm88_vm0, %v3413_v13  ;;  %4519 = vmatmul.mubr.msk.f32.gmra.mxu0 %vm88_vm0, %v3413_v13  ;;  %v3542_v13 = vld [vmem:[%s6859_s0 + $0x33] sm:$0xff] }
 0x16b   :  { %v1245_v8 = vadd.f32 %v1125_v28, %v5827_v46  ;;  %v6246_v30 = vadd.f32 %v1445_v25, %v1244_v51  ;;  %4521 = vmatprep.mubr.msk.f32.mxu0 %vm4728_vm1, %v4727_v0  ;;  %4540 = vmatprep.mubr.msk.f32.mxu1 %vm4728_vm1, %v4727_v0  ;;  %v3493_v51 = vld [vmem:[%s6859_s0 + $0x3a] sm:$0xff] }
 0x16c   :  { %v4181_v22 = vpop.f32.mrf.mxu1  ;;  %v4269_v34 = vpop.f32.mrf.mxu0  ;;  %3068 = vperm.xlu1 %4726, %v2949_v1   ;;  %v3544_v1 = vld [vmem:[%s6859_s0 + $0x43] sm:$0xff] }
 0x16e   :  { %v1130_v46 = vpop.f32.mrf.mxu1  ;;  %v1450_v12 = vpop.f32.mrf.mxu0  ;;  %4522 = vmatmul.mubr.msk.f32.gmra.mxu0 %vm88_vm0, %v3463_v33  ;;  %4541 = vmatmul.mubr.msk.f32.vlgmr.msra.gmra.mxu1 %vm88_vm0, %v3489_v36 }
 0x16f   :  { %v1246_v44 = vadd.f32 %v1130_v46, %v5846_v61  ;;  %v6264_v37 = vadd.f32 %v1450_v12, %v1245_v8  ;;  %4543 = vmatprep.mubr.msk.f32.mxu1 %vm4728_vm1, %v4727_v0  ;;  %4631 = vmatprep.mubr.msk.f32.mxu0 %vm4728_vm1, %v4727_v0  ;;  %v3543_v8 = vld [vmem:[%s6859_s0 + $0x3b] sm:$0xff]  ;;  %v3495_v12 = vld [vmem:[%s6859_s0 + $0x4a] sm:$0xff] }
 0x170   :  { %v4184_v27 = vpop.f32.mrf.mxu1  ;;  %v4272_v42 = vpop.f32.mrf.mxu0 }
 0x172   :  { %v1135_v61 = vpop.f32.mrf.mxu1  ;;  %v1455_v57 = vpop.f32.mrf.mxu0  ;;  %4544 = vmatmul.mubr.msk.f32.gmra.mxu1 %vm88_vm0, %v3490_v54  ;;  %4632 = vmatmul.mubr.msk.f32.vlgmr.msra.gmra.mxu0 %vm88_vm0, %v3539_v39 }
 0x173   :  { %v1247_v5 = vadd.f32 %v1135_v61, %v5866_v47  ;;  %v6279_v41 = vadd.f32 %v1455_v57, %v1246_v44  ;;  %4546 = vmatprep.mubr.msk.f32.mxu1 %vm4728_vm1, %v4727_v0  ;;  %4634 = vmatprep.mubr.msk.f32.mxu0 %vm4728_vm1, %v4727_v0  ;;  %v3496_v61 = vld [vmem:[%s6859_s0 + $0x52] sm:$0xff] }
 0x174   :  { %v4187_v32 = vpop.f32.mrf.mxu1  ;;  %v4275_v18 = vpop.f32.mrf.mxu0  ;;  %v3545_v57 = vld [vmem:[%s6859_s0 + $0x4b] sm:$0xff] }
 0x176   :  { %v1140_v50 = vpop.f32.mrf.mxu1  ;;  %v1460_v47 = vpop.f32.mrf.mxu0  ;;  %4547 = vmatmul.mubr.msk.f32.gmra.mxu1 %vm88_vm0, %v3491_v62  ;;  %4635 = vmatmul.mubr.msk.f32.gmra.mxu0 %vm88_vm0, %v3540_v2 }
 0x177   :  { %v1248_v45 = vadd.f32 %v1140_v50, %v5886_v20  ;;  %v6294_v9 = vadd.f32 %v1460_v47, %v1247_v5  ;;  %4549 = vmatprep.mubr.msk.f32.mxu1 %vm4728_vm1, %v4727_v0  ;;  %4637 = vmatprep.mubr.msk.f32.mxu0 %vm4728_vm1, %v4727_v0  ;;  %v3497_v50 = vld [vmem:[%s6859_s0 + $0x5a] sm:$0xff] }
 0x178   :  { %v4190_v49 = vpop.f32.mrf.mxu1  ;;  %v4278_v23 = vpop.f32.mrf.mxu0  ;;  %v3546_v47 = vld [vmem:[%s6859_s0 + $0x53] sm:$0xff] }
 0x17a   :  { %v1145_v14 = vpop.f32.mrf.mxu1  ;;  %v1465_v20 = vpop.f32.mrf.mxu0  ;;  %4550 = vmatmul.mubr.msk.f32.gmra.mxu1 %vm88_vm0, %v3492_v7  ;;  %4638 = vmatmul.mubr.msk.f32.gmra.mxu0 %vm88_vm0, %v3541_v10 }
 0x17b   :  { %v1249_v56 = vadd.f32 %v1145_v14, %v5906_v31  ;;  %v6309_v15 = vadd.f32 %v1465_v20, %v1248_v45  ;;  %4552 = vmatprep.mubr.msk.f32.mxu1 %vm4728_vm1, %v4727_v0  ;;  %4640 = vmatprep.mubr.msk.f32.mxu0 %vm4728_vm1, %v4727_v0  ;;  %v3498_v14 = vld [vmem:[%s6859_s0 + $0x62] sm:$0xff] }
 0x17c   :  { %v4193_v24 = vpop.f32.mrf.mxu1  ;;  %v4281_v52 = vpop.f32.mrf.mxu0  ;;  %v3547_v20 = vld [vmem:[%s6859_s0 + $0x5b] sm:$0xff] }
 0x17e   :  { %v1150_v28 = vpop.f32.mrf.mxu1  ;;  %v1470_v31 = vpop.f32.mrf.mxu0  ;;  %4553 = vmatmul.mubr.msk.f32.gmra.mxu1 %vm88_vm0, %v3493_v51  ;;  %4641 = vmatmul.mubr.msk.f32.gmra.mxu0 %vm88_vm0, %v3542_v13 }
 0x17f   :  { %v1250_v25 = vadd.f32 %v1150_v28, %v5926_v53  ;;  %v6324_v29 = vadd.f32 %v1470_v31, %v1249_v56  ;;  %4555 = vmatprep.mubr.msk.f32.mxu1 %vm4728_vm1, %v4727_v0  ;;  %4643 = vmatprep.mubr.msk.f32.mxu0 %vm4728_vm1, %v4727_v0  ;;  %v3499_v28 = vld [vmem:[%s6859_s0 + $0x6a] sm:$0xff] }
 0x180   :  { %v4196_v33 = vpop.f32.mrf.mxu1  ;;  %v4284_v36 = vpop.f32.mrf.mxu0  ;;  %v3548_v31 = vld [vmem:[%s6859_s0 + $0x63] sm:$0xff] }
 0x182   :  { %v1155_v22 = vpop.f32.mrf.mxu1  ;;  %v1475_v53 = vpop.f32.mrf.mxu0  ;;  %4556 = vmatmul.mubr.msk.f32.gmra.mxu1 %vm88_vm0, %v3494_v60  ;;  %4644 = vmatmul.mubr.msk.f32.gmra.mxu0 %vm88_vm0, %v3543_v8 }
 0x183   :  { %v1251_v34 = vadd.f32 %v1155_v22, %v5946_v43  ;;  %v6339_v46 = vadd.f32 %v1475_v53, %v1250_v25  ;;  %4558 = vmatprep.mubr.msk.f32.mxu1 %vm4728_vm1, %v4727_v0  ;;  %4646 = vmatprep.mubr.msk.f32.mxu0 %vm4728_vm1, %v4727_v0  ;;  %v3500_v22 = vld [vmem:[%s6859_s0 + $0x72] sm:$0xff] }
 0x184   :  { %v4199_v44 = vpop.f32.mrf.mxu1  ;;  %v4287_v54 = vpop.f32.mrf.mxu0  ;;  %v3549_v53 = vld [vmem:[%s6859_s0 + $0x6b] sm:$0xff] }
 0x186   :  { %v1160_v39 = vpop.f32.mrf.mxu1  ;;  %v1480_v43 = vpop.f32.mrf.mxu0  ;;  %4559 = vmatmul.mubr.msk.f32.gmra.mxu1 %vm88_vm0, %v3495_v12  ;;  %4647 = vmatmul.mubr.msk.f32.gmra.mxu0 %vm88_vm0, %v3544_v1 }
 0x187   :  { %v1252_v27 = vadd.f32 %v1160_v39, %v5966_v11  ;;  %v6354_v42 = vadd.f32 %v1480_v43, %v1251_v34  ;;  %4561 = vmatprep.mubr.msk.f32.mxu1 %vm4728_vm1, %v4727_v0  ;;  %4649 = vmatprep.mubr.msk.f32.mxu0 %vm4728_vm1, %v4727_v0  ;;  %v3501_v39 = vld [vmem:[%s6859_s0 + $0x7a] sm:$0xff] }
 0x188   :  { %v4202_v5 = vpop.f32.mrf.mxu1  ;;  %v4290_v62 = vpop.f32.mrf.mxu0  ;;  %v3550_v43 = vld [vmem:[%s6859_s0 + $0x73] sm:$0xff] }
 0x18a   :  { %v1165_v2 = vpop.f32.mrf.mxu1  ;;  %v1485_v11 = vpop.f32.mrf.mxu0  ;;  %4562 = vmatmul.mubr.msk.f32.gmra.mxu1 %vm88_vm0, %v3496_v61  ;;  %4650 = vmatmul.mubr.msk.f32.gmra.mxu0 %vm88_vm0, %v3545_v57 }
 0x18b   :  { %v1253_v32 = vadd.f32 %v1165_v2, %v5982_v21  ;;  %v6369_v18 = vadd.f32 %v1485_v11, %v1252_v27  ;;  %4564 = vmatprep.mubr.msk.f32.mxu1 %vm4728_vm1, %v4727_v0  ;;  %4652 = vmatprep.mubr.msk.f32.mxu0 %vm4728_vm1, %v4727_v0  ;;  %v3502_v2 = vld [vmem:[%s6859_s0 + $0x82] sm:$0xff] }
 0x18c   :  { %v4205_v45 = vpop.f32.mrf.mxu1  ;;  %v4293_v7 = vpop.f32.mrf.mxu0  ;;  %v3551_v11 = vld [vmem:[%s6859_s0 + $0x7b] sm:$0xff] }
 0x18e   :  { %v1170_v10 = vpop.f32.mrf.mxu1  ;;  %v1490_v21 = vpop.f32.mrf.mxu0  ;;  %4565 = vmatmul.mubr.msk.f32.gmra.mxu1 %vm88_vm0, %v3497_v50  ;;  %4653 = vmatmul.mubr.msk.f32.gmra.mxu0 %vm88_vm0, %v3546_v47 }
 0x18f   :  { %v1254_v49 = vadd.f32 %v1170_v10, %v5994_v17  ;;  %v6384_v23 = vadd.f32 %v1490_v21, %v1253_v32  ;;  %4567 = vmatprep.mubr.msk.f32.mxu1 %vm4728_vm1, %v4727_v0  ;;  %4655 = vmatprep.mubr.msk.f32.mxu0 %vm4728_vm1, %v4727_v0  ;;  %v3503_v10 = vld [vmem:[%s6859_s0 + $0x8a] sm:$0xff] }
 0x190   :  { %v4208_v56 = vpop.f32.mrf.mxu1  ;;  %v4296_v51 = vpop.f32.mrf.mxu0  ;;  %v3552_v21 = vld [vmem:[%s6859_s0 + $0x83] sm:$0xff] }
 0x192   :  { %v1175_v13 = vpop.f32.mrf.mxu1  ;;  %v1495_v17 = vpop.f32.mrf.mxu0  ;;  %4568 = vmatmul.mubr.msk.f32.gmra.mxu1 %vm88_vm0, %v3498_v14  ;;  %4656 = vmatmul.mubr.msk.f32.gmra.mxu0 %vm88_vm0, %v3547_v20 }
 0x193   :  { %v1255_v24 = vadd.f32 %v1175_v13, %v6006_v38  ;;  %v6399_v52 = vadd.f32 %v1495_v17, %v1254_v49  ;;  %4570 = vmatprep.mubr.msk.f32.mxu1 %vm4728_vm1, %v4727_v0  ;;  %4658 = vmatprep.mubr.msk.f32.mxu0 %vm4728_vm1, %v4727_v0  ;;  %v3504_v13 = vld [vmem:[%s6859_s0 + $0x92] sm:$0xff] }
 0x194   :  { %v4211_v25 = vpop.f32.mrf.mxu1  ;;  %v4299_v60 = vpop.f32.mrf.mxu0  ;;  %v3553_v17 = vld [vmem:[%s6859_s0 + $0x8b] sm:$0xff] }
 0x196   :  { %v1180_v8 = vpop.f32.mrf.mxu1  ;;  %v1500_v38 = vpop.f32.mrf.mxu0  ;;  %4571 = vmatmul.mubr.msk.f32.gmra.mxu1 %vm88_vm0, %v3499_v28  ;;  %4659 = vmatmul.mubr.msk.f32.gmra.mxu0 %vm88_vm0, %v3548_v31 }
 0x197   :  { %v1256_v33 = vadd.f32 %v1180_v8, %v6017_v16  ;;  %v6414_v36 = vadd.f32 %v1500_v38, %v1255_v24  ;;  %4573 = vmatprep.mubr.msk.f32.mxu1 %vm4728_vm1, %v4727_v0  ;;  %4661 = vmatprep.mubr.msk.f32.mxu0 %vm4728_vm1, %v4727_v0  ;;  %v3505_v8 = vld [vmem:[%s6859_s0 + $0x9a] sm:$0xff] }
 0x198   :  { %v4214_v34 = vpop.f32.mrf.mxu1  ;;  %v4302_v12 = vpop.f32.mrf.mxu0  ;;  %v3554_v38 = vld [vmem:[%s6859_s0 + $0x93] sm:$0xff] }
 0x19a   :  { %v1185_v1 = vpop.f32.mrf.mxu1  ;;  %v1505_v16 = vpop.f32.mrf.mxu0  ;;  %4574 = vmatmul.mubr.msk.f32.gmra.mxu1 %vm88_vm0, %v3500_v22  ;;  %4662 = vmatmul.mubr.msk.f32.gmra.mxu0 %vm88_vm0, %v3549_v53 }
 0x19b   :  { %v1257_v44 = vadd.f32 %v1185_v1, %v6032_v3  ;;  %v6429_v54 = vadd.f32 %v1505_v16, %v1256_v33  ;;  %4576 = vmatprep.mubr.msk.f32.mxu1 %vm4728_vm1, %v4727_v0  ;;  %4664 = vmatprep.mubr.msk.f32.mxu0 %vm4728_vm1, %v4727_v0  ;;  %v3506_v1 = vld [vmem:[%s6859_s0 + $0xa2] sm:$0xff] }
 0x19c   :  { %v4217_v27 = vpop.f32.mrf.mxu1  ;;  %v4305_v61 = vpop.f32.mrf.mxu0  ;;  %v3555_v16 = vld [vmem:[%s6859_s0 + $0x9b] sm:$0xff] }
 0x19e   :  { %v1190_v57 = vpop.f32.mrf.mxu1  ;;  %v1510_v3 = vpop.f32.mrf.mxu0  ;;  %4577 = vmatmul.mubr.msk.f32.gmra.mxu1 %vm88_vm0, %v3501_v39  ;;  %4665 = vmatmul.mubr.msk.f32.gmra.mxu0 %vm88_vm0, %v3550_v43 }
 0x19f   :  { %v1258_v5 = vadd.f32 %v1190_v57, %v6047_v40  ;;  %v6444_v62 = vadd.f32 %v1510_v3, %v1257_v44  ;;  %4579 = vmatprep.mubr.msk.f32.mxu1 %vm4728_vm1, %v4727_v0  ;;  %4667 = vmatprep.mubr.msk.f32.mxu0 %vm4728_vm1, %v4727_v0  ;;  %v3507_v57 = vld [vmem:[%s6859_s0 + $0xaa] sm:$0xff] }
 0x1a0   :  { %v4220_v32 = vpop.f32.mrf.mxu1  ;;  %v4308_v50 = vpop.f32.mrf.mxu0  ;;  %v3556_v3 = vld [vmem:[%s6859_s0 + $0xa3] sm:$0xff] }
 0x1a2   :  { %v1195_v47 = vpop.f32.mrf.mxu1  ;;  %v1515_v40 = vpop.f32.mrf.mxu0  ;;  %4580 = vmatmul.mubr.msk.f32.gmra.mxu1 %vm88_vm0, %v3502_v2  ;;  %4668 = vmatmul.mubr.msk.f32.gmra.mxu0 %vm88_vm0, %v3551_v11 }
 0x1a3   :  { %v1259_v45 = vadd.f32 %v1195_v47, %v6065_v48  ;;  %v6459_v7 = vadd.f32 %v1515_v40, %v1258_v5  ;;  %4582 = vmatprep.mubr.msk.f32.mxu1 %vm4728_vm1, %v4727_v0  ;;  %4670 = vmatprep.mubr.msk.f32.mxu0 %vm4728_vm1, %v4727_v0  ;;  %v3508_v47 = vld [vmem:[%s6859_s0 + $0xb2] sm:$0xff] }
 0x1a4   :  { %v4223_v49 = vpop.f32.mrf.mxu1  ;;  %v4311_v14 = vpop.f32.mrf.mxu0  ;;  %v3557_v40 = vld [vmem:[%s6859_s0 + $0xab] sm:$0xff] }
 0x1a6   :  { %v1200_v20 = vpop.f32.mrf.mxu1  ;;  %v1520_v48 = vpop.f32.mrf.mxu0  ;;  %4583 = vmatmul.mubr.msk.f32.gmra.mxu1 %vm88_vm0, %v3503_v10  ;;  %4671 = vmatmul.mubr.msk.f32.gmra.mxu0 %vm88_vm0, %v3552_v21 }
 0x1a7   :  { %v1260_v56 = vadd.f32 %v1200_v20, %v6083_v55  ;;  %v6474_v51 = vadd.f32 %v1520_v48, %v1259_v45  ;;  %4585 = vmatprep.mubr.msk.f32.mxu1 %vm4728_vm1, %v4727_v0  ;;  %4673 = vmatprep.mubr.msk.f32.mxu0 %vm4728_vm1, %v4727_v0  ;;  %v3509_v20 = vld [vmem:[%s6859_s0 + $0xba] sm:$0xff] }
 0x1a8   :  { %v4226_v24 = vpop.f32.mrf.mxu1  ;;  %v4314_v28 = vpop.f32.mrf.mxu0  ;;  %v3558_v48 = vld [vmem:[%s6859_s0 + $0xb3] sm:$0xff] }
 0x1aa   :  { %v1205_v31 = vpop.f32.mrf.mxu1  ;;  %v1525_v55 = vpop.f32.mrf.mxu0  ;;  %4586 = vmatmul.mubr.msk.f32.gmra.mxu1 %vm88_vm0, %v3504_v13  ;;  %4674 = vmatmul.mubr.msk.f32.gmra.mxu0 %vm88_vm0, %v3553_v17 }
 0x1ab   :  { %v1261_v25 = vadd.f32 %v1205_v31, %v6101_v59  ;;  %v6489_v60 = vadd.f32 %v1525_v55, %v1260_v56  ;;  %4588 = vmatprep.mubr.msk.f32.mxu1 %vm4728_vm1, %v4727_v0  ;;  %4676 = vmatprep.mubr.msk.f32.mxu0 %vm4728_vm1, %v4727_v0  ;;  %v3510_v31 = vld [vmem:[%s6859_s0 + $0xc2] sm:$0xff] }
 0x1ac   :  { %v4229_v33 = vpop.f32.mrf.mxu1  ;;  %v4317_v22 = vpop.f32.mrf.mxu0  ;;  %v3559_v55 = vld [vmem:[%s6859_s0 + $0xbb] sm:$0xff] }
 0x1ae   :  { %v1210_v53 = vpop.f32.mrf.mxu1  ;;  %v1530_v59 = vpop.f32.mrf.mxu0  ;;  %4589 = vmatmul.mubr.msk.f32.gmra.mxu1 %vm88_vm0, %v3505_v8  ;;  %4677 = vmatmul.mubr.msk.f32.gmra.mxu0 %vm88_vm0, %v3554_v38 }
 0x1af   :  { %v1262_v34 = vadd.f32 %v1210_v53, %v6119_v63  ;;  %v6504_v12 = vadd.f32 %v1530_v59, %v1261_v25  ;;  %4591 = vmatprep.mubr.msk.f32.mxu1 %vm4728_vm1, %v4727_v0  ;;  %4679 = vmatprep.mubr.msk.f32.mxu0 %vm4728_vm1, %v4727_v0  ;;  %v3511_v53 = vld [vmem:[%s6859_s0 + $0xca] sm:$0xff] }
 0x1b0   :  { %v4232_v44 = vpop.f32.mrf.mxu1  ;;  %v4320_v39 = vpop.f32.mrf.mxu0  ;;  %v3560_v59 = vld [vmem:[%s6859_s0 + $0xc3] sm:$0xff] }
 0x1b2   :  { %v1215_v43 = vpop.f32.mrf.mxu1  ;;  %v1535_v63 = vpop.f32.mrf.mxu0  ;;  %4592 = vmatmul.mubr.msk.f32.gmra.mxu1 %vm88_vm0, %v3506_v1  ;;  %4680 = vmatmul.mubr.msk.f32.gmra.mxu0 %vm88_vm0, %v3555_v16 }
 0x1b3   :  { %v1263_v27 = vadd.f32 %v1215_v43, %v6137_v4  ;;  %v6519_v61 = vadd.f32 %v1535_v63, %v1262_v34  ;;  %4594 = vmatprep.mubr.msk.f32.mxu1 %vm4728_vm1, %v4727_v0  ;;  %4682 = vmatprep.mubr.msk.f32.mxu0 %vm4728_vm1, %v4727_v0  ;;  %v3512_v43 = vld [vmem:[%s6859_s0 + $0xd2] sm:$0xff] }
 0x1b4   :  { %v4235_v5 = vpop.f32.mrf.mxu1  ;;  %v4323_v2 = vpop.f32.mrf.mxu0  ;;  %v3561_v63 = vld [vmem:[%s6859_s0 + $0xcb] sm:$0xff] }
 0x1b6   :  { %v1220_v11 = vpop.f32.mrf.mxu1  ;;  %v1540_v4 = vpop.f32.mrf.mxu0  ;;  %4595 = vmatmul.mubr.msk.f32.gmra.mxu1 %vm88_vm0, %v3507_v57  ;;  %4683 = vmatmul.mubr.msk.f32.gmra.mxu0 %vm88_vm0, %v3556_v3 }
 0x1b7   :  { %v1264_v32 = vadd.f32 %v1220_v11, %v6155_v26  ;;  %v6534_v50 = vadd.f32 %v1540_v4, %v1263_v27  ;;  %4597 = vmatprep.mubr.msk.f32.mxu1 %vm4728_vm1, %v4727_v0  ;;  %4685 = vmatprep.mubr.msk.f32.mxu0 %vm4728_vm1, %v4727_v0  ;;  %v3513_v11 = vld [vmem:[%s6859_s0 + $0xda] sm:$0xff] }
 0x1b8   :  { %v4238_v45 = vpop.f32.mrf.mxu1  ;;  %v4326_v10 = vpop.f32.mrf.mxu0  ;;  %v3562_v4 = vld [vmem:[%s6859_s0 + $0xd3] sm:$0xff] }
 0x1ba   :  { %v1225_v21 = vpop.f32.mrf.mxu1  ;;  %v1545_v26 = vpop.f32.mrf.mxu0  ;;  %4598 = vmatmul.mubr.msk.f32.gmra.mxu1 %vm88_vm0, %v3508_v47  ;;  %4686 = vmatmul.mubr.msk.f32.gmra.mxu0 %vm88_vm0, %v3557_v40 }
 0x1bb   :  { %v1265_v49 = vadd.f32 %v1225_v21, %v6173_v35  ;;  %v6549_v14 = vadd.f32 %v1545_v26, %v1264_v32  ;;  %4600 = vmatprep.mubr.msk.f32.mxu1 %vm4728_vm1, %v4727_v0  ;;  %4688 = vmatprep.mubr.msk.f32.mxu0 %vm4728_vm1, %v4727_v0  ;;  %v3563_v21 = vld [vmem:[%s6859_s0 + $0xdb] sm:$0xff] }
 0x1bc   :  { %v4241_v56 = vpop.f32.mrf.mxu1  ;;  %v4329_v13 = vpop.f32.mrf.mxu0 }
 0x1be   :  { %v1230_v17 = vpop.f32.mrf.mxu1  ;;  %v1550_v35 = vpop.f32.mrf.mxu0  ;;  %4601 = vmatmul.mubr.msk.f32.gmra.mxu1 %vm88_vm0, %v3509_v20  ;;  %4689 = vmatmul.mubr.msk.f32.gmra.mxu0 %vm88_vm0, %v3558_v48 }
 0x1bf   :  { %v1266_v24 = vadd.f32 %v1230_v17, %v6191_v58  ;;  %v6564_v28 = vadd.f32 %v1550_v35, %v1265_v49  ;;  %4603 = vmatprep.mubr.msk.f32.mxu1 %vm4728_vm1, %v4727_v0  ;;  %4691 = vmatprep.mubr.msk.f32.mxu0 %vm4728_vm1, %v4727_v0 }
 0x1c0   :  { %v4244_v25 = vpop.f32.mrf.mxu1  ;;  %v4332_v8 = vpop.f32.mrf.mxu0 }
 0x1c2   :  { %v1235_v38 = vpop.f32.mrf.mxu1  ;;  %v1555_v58 = vpop.f32.mrf.mxu0  ;;  %4604 = vmatmul.mubr.msk.f32.gmra.mxu1 %vm88_vm0, %v3510_v31  ;;  %4692 = vmatmul.mubr.msk.f32.gmra.mxu0 %vm88_vm0, %v3559_v55 }
 0x1c3   :  { %v1267_v33 = vadd.f32 %v1235_v38, %v6209_v6  ;;  %v6579_v22 = vadd.f32 %v1555_v58, %v1266_v24  ;;  %4606 = vmatprep.mubr.msk.f32.mxu1 %vm4728_vm1, %v4727_v0  ;;  %4694 = vmatprep.mubr.msk.f32.mxu0 %vm4728_vm1, %v4727_v0 }
 0x1c4   :  { %v4247_v34 = vpop.f32.mrf.mxu1  ;;  %v4335_v1 = vpop.f32.mrf.mxu0 }
 0x1c6   :  { %v1240_v16 = vpop.f32.mrf.mxu1  ;;  %v1560_v6 = vpop.f32.mrf.mxu0  ;;  %4607 = vmatmul.mubr.msk.f32.gmra.mxu1 %vm88_vm0, %v3511_v53  ;;  %4695 = vmatmul.mubr.msk.f32.gmra.mxu0 %vm88_vm0, %v3560_v59 }
 0x1c7   :  { %v1268_v44 = vadd.f32 %v1240_v16, %v6227_v19  ;;  %v6594_v39 = vadd.f32 %v1560_v6, %v1267_v33  ;;  %4609 = vmatprep.mubr.msk.f32.mxu1 %vm4728_vm1, %v4727_v0  ;;  %4697 = vmatprep.mubr.msk.f32.mxu0 %vm4728_vm1, %v4727_v0 }
 0x1c8   :  { %v4250_v27 = vpop.f32.mrf.mxu1  ;;  %v4338_v57 = vpop.f32.mrf.mxu0 }
 0x1ca   :  { %v1565_v3 = vpop.f32.mrf.mxu0  ;;  %v1770_v19 = vpop.f32.mrf.mxu1  ;;  %4610 = vmatmul.mubr.msk.f32.gmra.mxu1 %vm88_vm0, %v3512_v43  ;;  %4698 = vmatmul.mubr.msk.f32.gmra.mxu0 %vm88_vm0, %v3561_v63 }
 0x1cb   :  { %v6608_v5 = vadd.f32 %v1565_v3, %v1268_v44  ;;  %v1894_v2 = vadd.f32 %v1770_v19, %v6246_v30  ;;  %4612 = vmatprep.mubr.msk.f32.mxu1 %vm4728_vm1, %v4727_v0  ;;  %4700 = vmatprep.mubr.msk.f32.mxu0 %vm4728_vm1, %v4727_v0 }
 0x1cc   :  { %v4341_v32 = vpop.f32.mrf.mxu0  ;;  %v4360_v47 = vpop.f32.mrf.mxu1 }
 0x1ce   :  { %v1775_v40 = vpop.f32.mrf.mxu1  ;;  %v2095_v45 = vpop.f32.mrf.mxu0  ;;  %4613 = vmatmul.mubr.msk.f32.gmra.mxu1 %vm88_vm0, %v3513_v11  ;;  %4701 = vmatmul.mubr.msk.f32.gmra.mxu0 %vm88_vm0, %v3562_v4 }
 0x1cf   :  { %v1895_v30 = vadd.f32 %v1775_v40, %v6264_v37  ;;  %v6624_v10 = vadd.f32 %v2095_v45, %v1894_v2  ;;  %4703 = vmatprep.mubr.msk.f32.mxu0 %vm4728_vm1, %v4727_v0 }
 0x1d0   :  { %v4363_v26 = vpop.f32.mrf.mxu1  ;;  %v4451_v49 = vpop.f32.mrf.mxu0 }
 0x1d2   :  { %v1780_v20 = vpop.f32.mrf.mxu1  ;;  %v2100_v48 = vpop.f32.mrf.mxu0  ;;  %4704 = vmatmul.mubr.msk.f32.gmra.mxu0 %vm88_vm0, %v3563_v21 }
 0x1d3   :  { %v1896_v56 = vadd.f32 %v1780_v20, %v6279_v41  ;;  %v6633_v13 = vadd.f32 %v2100_v48, %v1895_v30 }
 0x1d4   :  { %v4366_v37 = vpop.f32.mrf.mxu1  ;;  %v4454_v17 = vpop.f32.mrf.mxu0 }
 0x1d6   :  { %v1785_v35 = vpop.f32.mrf.mxu1  ;;  %v2105_v24 = vpop.f32.mrf.mxu0 }
 0x1d7   :  { %v1897_v0 = vadd.f32 %v1785_v35, %v6294_v9  ;;  %v6636_v31 = vadd.f32 %v2105_v24, %v1896_v56 }
 0x1d8   :  { %v4369_v55 = vpop.f32.mrf.mxu1  ;;  %v4457_v25 = vpop.f32.mrf.mxu0 }
 0x1da   :  { %v1790_v8 = vpop.f32.mrf.mxu1  ;;  %v2110_v38 = vpop.f32.mrf.mxu0 }
 0x1db   :  { %v1898_v58 = vadd.f32 %v1790_v8, %v6309_v15  ;;  %v6639_v33 = vadd.f32 %v2110_v38, %v1897_v0 }
 0x1dc   :  { %v4372_v53 = vpop.f32.mrf.mxu1  ;;  %v4460_v41 = vpop.f32.mrf.mxu0 }
 0x1de   :  { %v1795_v59 = vpop.f32.mrf.mxu1  ;;  %v2115_v34 = vpop.f32.mrf.mxu0 }
 0x1df   :  { %v1899_v1 = vadd.f32 %v1795_v59, %v6324_v29  ;;  %v6642_v16 = vadd.f32 %v2115_v34, %v1898_v58 }
 0x1e0   :  { %v4375_v6 = vpop.f32.mrf.mxu1  ;;  %v4463_v9 = vpop.f32.mrf.mxu0 }
 0x1e2   :  { %v1800_v44 = vpop.f32.mrf.mxu1  ;;  %v2120_v43 = vpop.f32.mrf.mxu0 }
 0x1e3   :  { %v1900_v63 = vadd.f32 %v1800_v44, %v6339_v46  ;;  %v6645_v27 = vadd.f32 %v2120_v43, %v1899_v1 }
 0x1e4   :  { %v4378_v57 = vpop.f32.mrf.mxu1  ;;  %v4466_v15 = vpop.f32.mrf.mxu0 }
 0x1e6   :  { %v1805_v3 = vpop.f32.mrf.mxu1  ;;  %v2125_v19 = vpop.f32.mrf.mxu0 }
 0x1e7   :  { %v1901_v2 = vadd.f32 %v1805_v3, %v6354_v42  ;;  %v6648_v11 = vadd.f32 %v2125_v19, %v1900_v63 }
 0x1e8   :  { %v4381_v4 = vpop.f32.mrf.mxu1  ;;  %v4469_v29 = vpop.f32.mrf.mxu0 }
 0x1ea   :  { %v1810_v32 = vpop.f32.mrf.mxu1  ;;  %v2130_v47 = vpop.f32.mrf.mxu0 }
 0x1eb   :  { %v1902_v40 = vadd.f32 %v1810_v32, %v6369_v18  ;;  %v6651_v45 = vadd.f32 %v2130_v47, %v1901_v2 }
 0x1ec   :  { %v4384_v30 = vpop.f32.mrf.mxu1  ;;  %v4472_v46 = vpop.f32.mrf.mxu0 }
 0x1ee   :  { %v1815_v21 = vpop.f32.mrf.mxu1  ;;  %v2135_v26 = vpop.f32.mrf.mxu0 }
 0x1ef   :  { %v1903_v49 = vadd.f32 %v1815_v21, %v6384_v23  ;;  %v6654_v20 = vadd.f32 %v2135_v26, %v1902_v40 }
 0x1f0   :  { %v4387_v48 = vpop.f32.mrf.mxu1  ;;  %v4475_v42 = vpop.f32.mrf.mxu0 }
 0x1f2   :  { %v1820_v56 = vpop.f32.mrf.mxu1  ;;  %v2140_v37 = vpop.f32.mrf.mxu0 }
 0x1f3   :  { %v1904_v17 = vadd.f32 %v1820_v56, %v6399_v52  ;;  %v6657_v35 = vadd.f32 %v2140_v37, %v1903_v49 }
 0x1f4   :  { %v4390_v24 = vpop.f32.mrf.mxu1  ;;  %v4478_v18 = vpop.f32.mrf.mxu0 }
 0x1f6   :  { %v1825_v0 = vpop.f32.mrf.mxu1  ;;  %v2145_v55 = vpop.f32.mrf.mxu0 }
 0x1f7   :  { %v1905_v25 = vadd.f32 %v1825_v0, %v6414_v36  ;;  %v6660_v8 = vadd.f32 %v2145_v55, %v1904_v17 }
 0x1f8   :  { %v4393_v38 = vpop.f32.mrf.mxu1  ;;  %v4481_v23 = vpop.f32.mrf.mxu0 }
 0x1fa   :  { %v1830_v58 = vpop.f32.mrf.mxu1  ;;  %v2150_v53 = vpop.f32.mrf.mxu0 }
 0x1fb   :  { %v1906_v41 = vadd.f32 %v1830_v58, %v6429_v54  ;;  %v6663_v59 = vadd.f32 %v2150_v53, %v1905_v25 }
 0x1fc   :  { %v4396_v34 = vpop.f32.mrf.mxu1  ;;  %v4484_v52 = vpop.f32.mrf.mxu0 }
 0x1fe   :  { %v1835_v1 = vpop.f32.mrf.mxu1  ;;  %v2155_v6 = vpop.f32.mrf.mxu0 }
 0x1ff   :  { %v1907_v9 = vadd.f32 %v1835_v1, %v6444_v62  ;;  %v6666_v44 = vadd.f32 %v2155_v6, %v1906_v41 }
 0x200   :  { %v4399_v43 = vpop.f32.mrf.mxu1  ;;  %v4487_v36 = vpop.f32.mrf.mxu0 }
 0x202   :  { %v1840_v63 = vpop.f32.mrf.mxu1  ;;  %v2160_v57 = vpop.f32.mrf.mxu0 }
 0x203   :  { %v1908_v15 = vadd.f32 %v1840_v63, %v6459_v7  ;;  %v6669_v3 = vadd.f32 %v2160_v57, %v1907_v9 }
 0x204   :  { %v4402_v19 = vpop.f32.mrf.mxu1  ;;  %v4490_v54 = vpop.f32.mrf.mxu0 }
 0x206   :  { %v1845_v2 = vpop.f32.mrf.mxu1  ;;  %v2165_v4 = vpop.f32.mrf.mxu0 }
 0x207   :  { %v1909_v29 = vadd.f32 %v1845_v2, %v6474_v51  ;;  %v6672_v32 = vadd.f32 %v2165_v4, %v1908_v15 }
 0x208   :  { %v4405_v47 = vpop.f32.mrf.mxu1  ;;  %v4493_v62 = vpop.f32.mrf.mxu0 }
 0x20a   :  { %v1850_v40 = vpop.f32.mrf.mxu1  ;;  %v2170_v30 = vpop.f32.mrf.mxu0 }
 0x20b   :  { %v1910_v46 = vadd.f32 %v1850_v40, %v6489_v60  ;;  %v6675_v21 = vadd.f32 %v2170_v30, %v1909_v29 }
 0x20c   :  { %v4408_v26 = vpop.f32.mrf.mxu1  ;;  %v4496_v7 = vpop.f32.mrf.mxu0 }
 0x20e   :  { %v1855_v49 = vpop.f32.mrf.mxu1  ;;  %v2175_v48 = vpop.f32.mrf.mxu0 }
 0x20f   :  { %v1911_v42 = vadd.f32 %v1855_v49, %v6504_v12  ;;  %v6678_v56 = vadd.f32 %v2175_v48, %v1910_v46 }
 0x210   :  { %v4411_v37 = vpop.f32.mrf.mxu1  ;;  %v4499_v51 = vpop.f32.mrf.mxu0 }
 0x212   :  { %v1860_v17 = vpop.f32.mrf.mxu1  ;;  %v2180_v24 = vpop.f32.mrf.mxu0 }
 0x213   :  { %v1912_v18 = vadd.f32 %v1860_v17, %v6519_v61  ;;  %v6681_v0 = vadd.f32 %v2180_v24, %v1911_v42 }
 0x214   :  { %v4414_v55 = vpop.f32.mrf.mxu1  ;;  %v4502_v60 = vpop.f32.mrf.mxu0 }
 0x216   :  { %v1865_v25 = vpop.f32.mrf.mxu1  ;;  %v2185_v38 = vpop.f32.mrf.mxu0 }
 0x217   :  { %v1913_v23 = vadd.f32 %v1865_v25, %v6534_v50  ;;  %v6684_v58 = vadd.f32 %v2185_v38, %v1912_v18  ;;  %v2954_v18 = vpop.permute.xlu0 %2953  ;;  %v6707_v25 = vld [vmem:[%s6861_s2] ss:$0 sm:$0xff] }
 0x218   :  { %v4417_v53 = vpop.f32.mrf.mxu1  ;;  %v4505_v12 = vpop.f32.mrf.mxu0 }
 0x21a   :  { %v1870_v41 = vpop.f32.mrf.mxu1  ;;  %v2190_v34 = vpop.f32.mrf.mxu0 }
 0x21b   :  { %v1914_v52 = vadd.f32 %v1870_v41, %v6549_v14  ;;  %v6687_v1 = vadd.f32 %v2190_v34, %v1913_v23 }
 0x21c   :  { %v4420_v6 = vpop.f32.mrf.mxu1  ;;  %v4508_v61 = vpop.f32.mrf.mxu0 }
 0x21e   :  { %v1875_v9 = vpop.f32.mrf.mxu1  ;;  %v2195_v43 = vpop.f32.mrf.mxu0 }
 0x21f   :  { %v1915_v36 = vadd.f32 %v1875_v9, %v6564_v28  ;;  %v6690_v63 = vadd.f32 %v2195_v43, %v1914_v52 }
 0x220   :  { %v4423_v57 = vpop.f32.mrf.mxu1  ;;  %v4511_v50 = vpop.f32.mrf.mxu0 }
 0x221   :  { %v2964_v57 = vpop.permute.xlu1 %2963 }
 0x222   :  { %v1880_v15 = vpop.f32.mrf.mxu1  ;;  %v2200_v19 = vpop.f32.mrf.mxu0 }
 0x223   :  { %v1916_v54 = vadd.f32 %v1880_v15, %v6579_v22  ;;  %v6693_v2 = vadd.f32 %v2200_v19, %v1915_v36 }
 0x224   :  { %v4426_v4 = vpop.f32.mrf.mxu1  ;;  %v4514_v14 = vpop.f32.mrf.mxu0 }
 0x226   :  { %v1885_v29 = vpop.f32.mrf.mxu1  ;;  %v2205_v47 = vpop.f32.mrf.mxu0 }
 0x227   :  { %v1917_v62 = vadd.f32 %v1885_v29, %v6594_v39  ;;  %v6696_v40 = vadd.f32 %v2205_v47, %v1916_v54 }
 0x228   :  { %v4429_v30 = vpop.f32.mrf.mxu1  ;;  %v4517_v28 = vpop.f32.mrf.mxu0 }
 0x229   :  { %v2969_v28 = vpop.permute.xlu1 %2968 }
 0x22a   :  { %v1890_v46 = vpop.f32.mrf.mxu1  ;;  %v2210_v26 = vpop.f32.mrf.mxu0 }
 0x22b   :  { %v1918_v7 = vadd.f32 %v1890_v46, %v6608_v5  ;;  %v6699_v49 = vadd.f32 %v2210_v26, %v1917_v62 }
 0x22c   :  { %v4432_v48 = vpop.f32.mrf.mxu1  ;;  %v4520_v22 = vpop.f32.mrf.mxu0 }
 0x22e   :  { %v2215_v42 = vpop.f32.mrf.mxu0  ;;  %v2420_v37 = vpop.f32.mrf.mxu1 }
 0x22f   :  { %v6701_v51 = vadd.f32 %v2215_v42, %v1918_v7  ;;  %v2544_v39 = vadd.f32 %v2420_v37, %v6624_v10  ;;  %v2959_v10 = vpop.permute.xlu0 %2958 }
 0x230   :  { %v4523_v17 = vpop.f32.mrf.mxu0  ;;  %v4542_v24 = vpop.f32.mrf.mxu1 }
 0x232   :  { %v2425_v55 = vpop.f32.mrf.mxu1  ;;  %v2745_v60 = vpop.f32.mrf.mxu0 }
 0x233   :  { %v2869_v5 = vadd.f32 %v2745_v60, %v2544_v39  ;;  %v2545_v53 = vadd.f32 %v2425_v55, %v6633_v13  ;;  %v2974_v39 = vpop.permute.xlu0 %2973 }
 0x234   :  { %v4545_v38 = vpop.f32.mrf.mxu1  ;;  %v4633_v23 = vpop.f32.mrf.mxu0 }
 0x235   :  { %v2901_v12 = vadd.f32 %v6707_v25, %v2869_v5 }
 0x236   :  { %v2430_v41 = vpop.f32.mrf.mxu1  ;;  %v2750_v34 = vpop.f32.mrf.mxu0 }
 0x237   :  { %v3076_v52 = vmul.f32 %v2954_v18, %v2901_v12  ;;  %v2870_v6 = vadd.f32 %v2750_v34, %v2545_v53  ;;  %v2546_v43 = vadd.f32 %v2430_v41, %v6636_v31  ;;  %v2979_v41 = vpop.permute.xlu1 %2978 }
 0x238   :  { %v4548_v61 = vpop.f32.mrf.mxu1  ;;  %v4636_v9 = vpop.f32.mrf.mxu0 }
 0x239   :  { %3101 = vst.msk [vmem:[%s6862_s4] sm:$0xff] %vm88_vm0, %v3076_v52  ;;  %v2902_v36 = vadd.f32 %v6707_v25, %v2870_v6 }
 0x23a   :  { %v2435_v13 = vpop.f32.mrf.mxu1  ;;  %v2755_v50 = vpop.f32.mrf.mxu0 }
 0x23b   :  { %v3077_v15 = vmul.f32 %v2959_v10, %v2902_v36  ;;  %v2871_v19 = vadd.f32 %v2755_v50, %v2546_v43  ;;  %v2547_v14 = vadd.f32 %v2435_v13, %v6639_v33  ;;  %v2984_v43 = vpop.permute.xlu0 %2983 }
 0x23c   :  { %v4551_v54 = vpop.f32.mrf.mxu1  ;;  %v4639_v4 = vpop.f32.mrf.mxu0 }
 0x23d   :  { %3102 = vst.msk [vmem:[%s6862_s4 + $0x8] sm:$0xff] %vm88_vm0, %v3077_v15  ;;  %v2903_v29 = vadd.f32 %v6707_v25, %v2871_v19  ;;  %v2989_v4 = vpop.permute.xlu1 %2988 }
 0x23e   :  { %v2440_v47 = vpop.f32.mrf.mxu1  ;;  %v2760_v31 = vpop.f32.mrf.mxu0 }
 0x23f   :  { %v3078_v62 = vmul.f32 %v2964_v57, %v2903_v29  ;;  %v2872_v30 = vadd.f32 %v2760_v31, %v2547_v14  ;;  %v2548_v7 = vadd.f32 %v2440_v47, %v6642_v16 }
 0x240   :  { %v4554_v46 = vpop.f32.mrf.mxu1  ;;  %v4642_v26 = vpop.f32.mrf.mxu0 }
 0x241   :  { %3103 = vst.msk [vmem:[%s6862_s4 + $0x10] sm:$0xff] %vm88_vm0, %v3078_v62  ;;  %v2904_v48 = vadd.f32 %v6707_v25, %v2872_v30  ;;  %v2994_v46 = vpop.permute.xlu0 %2993 }
 0x242   :  { %v2445_v22 = vpop.f32.mrf.mxu1  ;;  %v2765_v33 = vpop.f32.mrf.mxu0 }
 0x243   :  { %v3079_v42 = vmul.f32 %v2969_v28, %v2904_v48  ;;  %v2873_v37 = vadd.f32 %v2765_v33, %v2548_v7  ;;  %v2549_v18 = vadd.f32 %v2445_v22, %v6645_v27 }
 0x244   :  { %v4557_v17 = vpop.f32.mrf.mxu1  ;;  %v4645_v24 = vpop.f32.mrf.mxu0 }
 0x245   :  { %3104 = vst.msk [vmem:[%s6862_s4 + $0x18] sm:$0xff] %vm88_vm0, %v3079_v42  ;;  %v2905_v55 = vadd.f32 %v6707_v25, %v2873_v37  ;;  %v2999_v17 = vpop.permute.xlu1 %2998 }
 0x246   :  { %v2450_v60 = vpop.f32.mrf.mxu1  ;;  %v2770_v16 = vpop.f32.mrf.mxu0 }
 0x247   :  { %v3080_v5 = vmul.f32 %v2974_v39, %v2905_v55  ;;  %v2874_v38 = vadd.f32 %v2770_v16, %v2549_v18  ;;  %v2550_v12 = vadd.f32 %v2450_v60, %v6648_v11 }
 0x248   :  { %v4560_v23 = vpop.f32.mrf.mxu1  ;;  %v4648_v53 = vpop.f32.mrf.mxu0 }
 0x249   :  { %3105 = vst.msk [vmem:[%s6862_s4 + $0x20] sm:$0xff] %vm88_vm0, %v3080_v5  ;;  %v2906_v34 = vadd.f32 %v6707_v25, %v2874_v38  ;;  %v3004_v38 = vpop.permute.xlu0 %3003 }
 0x24a   :  { %v2455_v52 = vpop.f32.mrf.mxu1  ;;  %v2775_v27 = vpop.f32.mrf.mxu0 }
 0x24b   :  { %v3081_v6 = vmul.f32 %v2979_v41, %v2906_v34  ;;  %v2875_v10 = vadd.f32 %v2775_v27, %v2550_v12  ;;  %v2551_v36 = vadd.f32 %v2455_v52, %v6651_v45 }
 0x24c   :  { %v4563_v61 = vpop.f32.mrf.mxu1  ;;  %v4651_v9 = vpop.f32.mrf.mxu0 }
 0x24d   :  { %3106 = vst.msk [vmem:[%s6862_s4 + $0x28] sm:$0xff] %vm88_vm0, %v3081_v6  ;;  %v2907_v57 = vadd.f32 %v6707_v25, %v2875_v10  ;;  %v3009_v6 = vpop.permute.xlu1 %3008 }
 0x24e   :  { %v2460_v11 = vpop.f32.mrf.mxu1  ;;  %v2780_v13 = vpop.f32.mrf.mxu0 }
 0x24f   :  { %v3082_v50 = vmul.f32 %v2984_v43, %v2907_v57  ;;  %v2876_v15 = vadd.f32 %v2780_v13, %v2551_v36  ;;  %v2552_v14 = vadd.f32 %v2460_v11, %v6654_v20  ;;  %v3014_v13 = vpop.permute.xlu0 %3013 }
 0x250   :  { %v4566_v19 = vpop.f32.mrf.mxu1  ;;  %v4654_v54 = vpop.f32.mrf.mxu0 }
 0x251   :  { %3107 = vst.msk [vmem:[%s6862_s4 + $0x30] sm:$0xff] %vm88_vm0, %v3082_v50  ;;  %v2908_v29 = vadd.f32 %v6707_v25, %v2876_v15 }
 0x252   :  { %v2465_v47 = vpop.f32.mrf.mxu1  ;;  %v2785_v45 = vpop.f32.mrf.mxu0 }
 0x253   :  { %v3083_v31 = vmul.f32 %v2989_v4, %v2908_v29  ;;  %v2877_v62 = vadd.f32 %v2785_v45, %v2552_v14  ;;  %v2553_v26 = vadd.f32 %v2465_v47, %v6657_v35  ;;  %v3019_v47 = vpop.permute.xlu1 %3018 }
 0x254   :  { %v4569_v30 = vpop.f32.mrf.mxu1  ;;  %v4657_v28 = vpop.f32.mrf.mxu0 }
 0x255   :  { %3108 = vst.msk [vmem:[%s6862_s4 + $0x38] sm:$0xff] %vm88_vm0, %v3083_v31  ;;  %v2909_v7 = vadd.f32 %v6707_v25, %v2877_v62 }
 0x256   :  { %v2470_v48 = vpop.f32.mrf.mxu1  ;;  %v2790_v20 = vpop.f32.mrf.mxu0 }
 0x257   :  { %v3084_v22 = vmul.f32 %v2994_v46, %v2909_v7  ;;  %v2878_v33 = vadd.f32 %v2790_v20, %v2553_v26  ;;  %v2554_v24 = vadd.f32 %v2470_v48, %v6660_v8  ;;  %v3024_v7 = vpop.permute.xlu0 %3023 }
 0x258   :  { %v4572_v42 = vpop.f32.mrf.mxu1  ;;  %v4660_v37 = vpop.f32.mrf.mxu0 }
 0x259   :  { %3109 = vst.msk [vmem:[%s6862_s4 + $0x40] sm:$0xff] %vm88_vm0, %v3084_v22  ;;  %v2910_v39 = vadd.f32 %v6707_v25, %v2878_v33 }
 0x25a   :  { %v2475_v18 = vpop.f32.mrf.mxu1  ;;  %v2795_v35 = vpop.f32.mrf.mxu0 }
 0x25b   :  { %v3085_v55 = vmul.f32 %v2999_v17, %v2910_v39  ;;  %v2879_v60 = vadd.f32 %v2795_v35, %v2554_v24  ;;  %v2555_v23 = vadd.f32 %v2475_v18, %v6663_v59  ;;  %v3029_v24 = vpop.permute.xlu1 %3028 }
 0x25c   :  { %v4575_v16 = vpop.f32.mrf.mxu1  ;;  %v4663_v5 = vpop.f32.mrf.mxu0 }
 0x25d   :  { %3110 = vst.msk [vmem:[%s6862_s4 + $0x48] sm:$0xff] %vm88_vm0, %v3085_v55  ;;  %v2911_v53 = vadd.f32 %v6707_v25, %v2879_v60 }
 0x25e   :  { %v2480_v12 = vpop.f32.mrf.mxu1  ;;  %v2800_v8 = vpop.f32.mrf.mxu0 }
 0x25f   :  { %v3086_v41 = vmul.f32 %v3004_v38, %v2911_v53  ;;  %v2880_v34 = vadd.f32 %v2800_v8, %v2555_v23  ;;  %v2556_v10 = vadd.f32 %v2480_v12, %v6666_v44  ;;  %v3034_v38 = vpop.permute.xlu0 %3033 }
 0x260   :  { %v4578_v52 = vpop.f32.mrf.mxu1  ;;  %v4666_v27 = vpop.f32.mrf.mxu0 }
 0x261   :  { %3111 = vst.msk [vmem:[%s6862_s4 + $0x50] sm:$0xff] %vm88_vm0, %v3086_v41  ;;  %v2912_v61 = vadd.f32 %v6707_v25, %v2880_v34  ;;  %v3039_v27 = vpop.permute.xlu1 %3038 }
 0x262   :  { %v2485_v9 = vpop.f32.mrf.mxu1  ;;  %v2805_v59 = vpop.f32.mrf.mxu0 }
 0x263   :  { %v3087_v43 = vmul.f32 %v3009_v6, %v2912_v61  ;;  %v2881_v36 = vadd.f32 %v2805_v59, %v2556_v10  ;;  %v2557_v50 = vadd.f32 %v2485_v9, %v6669_v3 }
 0x264   :  { %v4581_v57 = vpop.f32.mrf.mxu1  ;;  %v4669_v11 = vpop.f32.mrf.mxu0 }
 0x265   :  { %3112 = vst.msk [vmem:[%s6862_s4 + $0x58] sm:$0xff] %vm88_vm0, %v3087_v43  ;;  %v2913_v15 = vadd.f32 %v6707_v25, %v2881_v36  ;;  %v3044_v57 = vpop.permute.xlu0 %3043 }
 0x266   :  { %v2490_v19 = vpop.f32.mrf.mxu1  ;;  %v2810_v44 = vpop.f32.mrf.mxu0 }
 0x267   :  { %v3088_v54 = vmul.f32 %v3014_v13, %v2913_v15  ;;  %v2882_v4 = vadd.f32 %v2810_v44, %v2557_v50  ;;  %v2558_v45 = vadd.f32 %v2490_v19, %v6672_v32 }
 0x268   :  { %v4584_v14 = vpop.f32.mrf.mxu1  ;;  %v4672_v29 = vpop.f32.mrf.mxu0 }
 0x269   :  { %3113 = vst.msk [vmem:[%s6862_s4 + $0x60] sm:$0xff] %vm88_vm0, %v3088_v54  ;;  %v2914_v31 = vadd.f32 %v6707_v25, %v2882_v4  ;;  %v3049_v4 = vpop.permute.xlu1 %3048 }
 0x26a   :  { %v2495_v62 = vpop.f32.mrf.mxu1  ;;  %v2815_v3 = vpop.f32.mrf.mxu0 }
 0x26b   :  { %v3089_v30 = vmul.f32 %v3019_v47, %v2914_v31  ;;  %v2883_v28 = vadd.f32 %v2815_v3, %v2558_v45  ;;  %v2559_v48 = vadd.f32 %v2495_v62, %v6675_v21 }
 0x26c   :  { %v4587_v46 = vpop.f32.mrf.mxu1  ;;  %v4675_v26 = vpop.f32.mrf.mxu0 }
 0x26d   :  { %3114 = vst.msk [vmem:[%s6862_s4 + $0x68] sm:$0xff] %vm88_vm0, %v3089_v30  ;;  %v2915_v20 = vadd.f32 %v6707_v25, %v2883_v28  ;;  %v3054_v30 = vpop.permute.xlu0 %3053 }
 0x26e   :  { %v2500_v22 = vpop.f32.mrf.mxu1  ;;  %v2820_v32 = vpop.f32.mrf.mxu0 }
 0x26f   :  { %v3090_v33 = vmul.f32 %v3024_v7, %v2915_v20  ;;  %v2884_v42 = vadd.f32 %v2820_v32, %v2559_v48  ;;  %v2560_v39 = vadd.f32 %v2500_v22, %v6678_v56  ;;  %v3059_v32 = vpop.permute.xlu1 %3058 }
 0x270   :  { %v4590_v37 = vpop.f32.mrf.mxu1  ;;  %v4678_v17 = vpop.f32.mrf.mxu0 }
 0x271   :  { %3115 = vst.msk [vmem:[%s6862_s4 + $0x70] sm:$0xff] %vm88_vm0, %v3090_v33  ;;  %v2916_v18 = vadd.f32 %v6707_v25, %v2884_v42 }
 0x272   :  { %v2505_v35 = vpop.f32.mrf.mxu1  ;;  %v2825_v21 = vpop.f32.mrf.mxu0 }
 0x273   :  { %v3091_v55 = vmul.f32 %v3029_v24, %v2916_v18  ;;  %v2885_v60 = vadd.f32 %v2825_v21, %v2560_v39  ;;  %v2561_v23 = vadd.f32 %v2505_v35, %v6681_v0  ;;  %v3064_v35 = vpop.permute.xlu0 %3063 }
 0x274   :  { %v4593_v16 = vpop.f32.mrf.mxu1  ;;  %v4681_v5 = vpop.f32.mrf.mxu0 }
 0x275   :  { %3116 = vst.msk [vmem:[%s6862_s4 + $0x78] sm:$0xff] %vm88_vm0, %v3091_v55  ;;  %v2917_v53 = vadd.f32 %v6707_v25, %v2885_v60 }
 0x276   :  { %v2510_v12 = vpop.f32.mrf.mxu1  ;;  %v2830_v56 = vpop.f32.mrf.mxu0 }
 0x277   :  { %v3092_v8 = vmul.f32 %v3034_v38, %v2917_v53  ;;  %v2886_v41 = vadd.f32 %v2830_v56, %v2561_v23  ;;  %v2562_v6 = vadd.f32 %v2510_v12, %v6684_v58  ;;  %v3069_v56 = vpop.permute.xlu1 %3068 }
 0x278   :  { %v4596_v34 = vpop.f32.mrf.mxu1  ;;  %v4684_v52 = vpop.f32.mrf.mxu0 }
 0x279   :  { %3117 = vst.msk [vmem:[%s6862_s4 + $0x80] sm:$0xff] %vm88_vm0, %v3092_v8  ;;  %v2918_v10 = vadd.f32 %v6707_v25, %v2886_v41 }
 0x27a   :  { %v2515_v61 = vpop.f32.mrf.mxu1  ;;  %v2835_v0 = vpop.f32.mrf.mxu0 }
 0x27b   :  { %v3093_v9 = vmul.f32 %v3039_v27, %v2918_v10  ;;  %v2887_v59 = vadd.f32 %v2835_v0, %v2562_v6  ;;  %v2563_v11 = vadd.f32 %v2515_v61, %v6687_v1  ;;  %v3074_v27 = vpop.permute.xlu0 %3073 }
 0x27c   :  { %v4599_v43 = vpop.f32.mrf.mxu1  ;;  %v4687_v36 = vpop.f32.mrf.mxu0 }
 0x27d   :  { %3118 = vst.msk [vmem:[%s6862_s4 + $0x88] sm:$0xff] %vm88_vm0, %v3093_v9  ;;  %v2919_v13 = vadd.f32 %v6707_v25, %v2887_v59 }
 0x27e   :  { %v2520_v50 = vpop.f32.mrf.mxu1  ;;  %v2840_v58 = vpop.f32.mrf.mxu0 }
 0x27f   :  { %v3094_v15 = vmul.f32 %v3044_v57, %v2919_v13  ;;  %v2888_v19 = vadd.f32 %v2840_v58, %v2563_v11  ;;  %v2564_v14 = vadd.f32 %v2520_v50, %v6690_v63 }
 0x280   :  { %v4602_v44 = vpop.f32.mrf.mxu1  ;;  %v4690_v54 = vpop.f32.mrf.mxu0 }
 0x281   :  { %3119 = vst.msk [vmem:[%s6862_s4 + $0x90] sm:$0xff] %vm88_vm0, %v3094_v15  ;;  %v2920_v29 = vadd.f32 %v6707_v25, %v2888_v19 }
 0x282   :  { %v2525_v47 = vpop.f32.mrf.mxu1  ;;  %v2845_v1 = vpop.f32.mrf.mxu0 }
 0x283   :  { %v3095_v45 = vmul.f32 %v3049_v4, %v2920_v29  ;;  %v2889_v31 = vadd.f32 %v2845_v1, %v2564_v14  ;;  %v2565_v28 = vadd.f32 %v2525_v47, %v6693_v2 }
 0x284   :  { %v4605_v62 = vpop.f32.mrf.mxu1  ;;  %v4693_v3 = vpop.f32.mrf.mxu0 }
 0x285   :  { %3120 = vst.msk [vmem:[%s6862_s4 + $0x98] sm:$0xff] %vm88_vm0, %v3095_v45  ;;  %v2921_v46 = vadd.f32 %v6707_v25, %v2889_v31 }
 0x286   :  { %v2530_v26 = vpop.f32.mrf.mxu1  ;;  %v2850_v63 = vpop.f32.mrf.mxu0 }
 0x287   :  { %v3096_v7 = vmul.f32 %v3054_v30, %v2921_v46  ;;  %v2890_v48 = vadd.f32 %v2850_v63, %v2565_v28  ;;  %v2566_v33 = vadd.f32 %v2530_v26, %v6696_v40 }
 0x288   :  { %v4608_v20 = vpop.f32.mrf.mxu1  ;;  %v4696_v22 = vpop.f32.mrf.mxu0 }
 0x289   :  { %3121 = vst.msk [vmem:[%s6862_s4 + $0xa0] sm:$0xff] %vm88_vm0, %v3096_v7  ;;  %v2922_v42 = vadd.f32 %v6707_v25, %v2890_v48 }
 0x28a   :  { %v2535_v37 = vpop.f32.mrf.mxu1  ;;  %v2855_v2 = vpop.f32.mrf.mxu0 }
 0x28b   :  { %v3097_v17 = vmul.f32 %v3059_v32, %v2922_v42  ;;  %v2891_v24 = vadd.f32 %v2855_v2, %v2566_v33  ;;  %v2567_v21 = vadd.f32 %v2535_v37, %v6699_v49 }
 0x28c   :  { %v4611_v39 = vpop.f32.mrf.mxu1  ;;  %v4699_v18 = vpop.f32.mrf.mxu0 }
 0x28d   :  { %3122 = vst.msk [vmem:[%s6862_s4 + $0xa8] sm:$0xff] %vm88_vm0, %v3097_v17  ;;  %v2923_v55 = vadd.f32 %v6707_v25, %v2891_v24 }
 0x28e   :  { %v2540_v60 = vpop.f32.mrf.mxu1  ;;  %v2860_v40 = vpop.f32.mrf.mxu0 }
 0x28f   :  { %v3098_v16 = vmul.f32 %v3064_v35, %v2923_v55  ;;  %v2892_v5 = vadd.f32 %v2860_v40, %v2567_v21  ;;  %v2568_v53 = vadd.f32 %v2540_v60, %v6701_v51 }
 0x290   :  { %v4702_v38 = vpop.f32.mrf.mxu0  ;;  %v4614_v23 = vpop.f32.mrf.mxu1 }
 0x291   :  { %3123 = vst.msk [vmem:[%s6862_s4 + $0xb0] sm:$0xff] %vm88_vm0, %v3098_v16  ;;  %v2924_v12 = vadd.f32 %v6707_v25, %v2892_v5 }
 0x292   :  { %v2865_v8 = vpop.f32.mrf.mxu0 }
 0x293   :  { %v3099_v49 = vmul.f32 %v3069_v56, %v2924_v12  ;;  %v2893_v41 = vadd.f32 %v2865_v8, %v2568_v53 }
 0x294   :  { %v4705_v34 = vpop.f32.mrf.mxu0 }
 0x295   :  { %3124 = vst.msk [vmem:[%s6862_s4 + $0xb8] sm:$0xff] %vm88_vm0, %v3099_v49  ;;  %v2925_v52 = vadd.f32 %v6707_v25, %v2893_v41 }
 0x297   :  { %v3100_v6 = vmul.f32 %v3074_v27, %v2925_v52 }
 0x299   :  { %3125 = vst.msk [vmem:[%s6862_s4 + $0xc0] sm:$0xff] %vm88_vm0, %v3100_v6 }

</bundles_post_ra>
